<compile_context>
chip_gen: v7x
topology: tpu7x:2x2x1
jax: 0.10.0
libtpu: 0.0.40
codegen_flags: <defaults>
</compile_context>

<pallas_src>
from functools import partial

import jax
import jax.numpy as jnp
from jax import lax
from jax.experimental import pallas as pl
from jax.experimental.pallas import tpu as pltpu


def _round_up(x, m):
    return ((x + m - 1) // m) * m


def _pick_vmem_limit():
    """~48 MiB on v7x (64 MiB physical VMEM), ~112 MiB on v5e/v6e (128 MiB)."""
    try:
        cap = pltpu.get_tpu_info().vmem_capacity_bytes
    except Exception:
        cap = 64 * 1024 * 1024
    return int(max(32 * 1024 * 1024,
                   min(cap - 16 * 1024 * 1024, 112 * 1024 * 1024)))


def _upconv_kernel(xb_ref, xh_ref, w_ref, o_ref):
    """One (batch, row-block) tile of the 2x2 valid conv (bias-free) + ReLU.

    xb_ref: (1, TH, Wp, C)     bf16  body rows [r*TH, r*TH+TH) of padded input
    xh_ref: (1, 1,  Wp, C)     bf16  halo row   r*TH+TH        of padded input
    w_ref : (4, C, Opad)       bf16  per-tap weights, tap k = kh*2 + kw
    o_ref : (1, TH, Wo, Opad)  f32   conv+ReLU output rows [r*TH, r*TH+TH)
    """
    th = xb_ref.shape[1]
    c = xb_ref.shape[3]
    wo = o_ref.shape[2]
    op = o_ref.shape[3]

    body = xb_ref[0]                       # (TH, Wp, C) bf16
    halo = xh_ref[0]                       # (1,  Wp, C) bf16

    # Column-shifted views of the (cheap, bf16, C-wide) input; read once each.
    x0 = body[:, :wo, :]                   # cols j   -> taps (*, 0)
    x1 = body[:, 1:wo + 1, :]              # cols j+1 -> taps (*, 1)
    h0 = halo[:, :wo, :]
    h1 = halo[:, 1:wo + 1, :]

    w00 = w_ref[0]                         # (C, Opad) each
    w01 = w_ref[1]
    w10 = w_ref[2]
    w11 = w_ref[3]

    def mm(x, w):
        m = x.shape[0] * x.shape[1]
        return jnp.dot(x.reshape(m, c), w, preferred_element_type=jnp.float32)

    # Output rows 0..TH-2: upper taps from body row i, lower taps from body row i+1.
    main = (mm(x0[:th - 1], w00) + mm(x1[:th - 1], w01)
            + mm(x0[1:], w10) + mm(x1[1:], w11))          # ((TH-1)*Wo, Opad) f32
    o_ref[0, :th - 1] = jnp.maximum(main, 0.0).reshape(
        th - 1, wo, op).astype(o_ref.dtype)

    # Output row TH-1: upper taps from body row TH-1, lower taps from the halo row.
    last = (mm(x0[th - 1:], w00) + mm(x1[th - 1:], w01)
            + mm(h0, w10) + mm(h1, w11))                  # (Wo, Opad) f32
    o_ref[0, th - 1:] = jnp.maximum(last, 0.0).reshape(
        1, wo, op).astype(o_ref.dtype)


def _bilinear_upsample_nhwc_align_corners(x, scale):
    """(N, H, W, C) -> (N, H*s, W*s, C); F.interpolate bilinear, align_corners=True."""
    n, h, w, c = x.shape
    ho, wo = h * scale, w * scale

    def coords(out_size, in_size):
        if out_size == 1 or in_size == 1:
            src = jnp.zeros((out_size,), jnp.float32)
        else:
            src = jnp.arange(out_size, dtype=jnp.float32) * (
                (in_size - 1) / (out_size - 1))
        lo = jnp.clip(jnp.floor(src).astype(jnp.int32), 0, in_size - 1)
        hi = jnp.clip(lo + 1, 0, in_size - 1)
        return lo, hi, src - lo.astype(jnp.float32)

    y0, y1, fy = coords(ho, h)
    x0, x1, fx = coords(wo, w)
    rows = (x[:, y0, :, :] * (1.0 - fy)[None, :, None, None]
            + x[:, y1, :, :] * fy[None, :, None, None])          # (N, Ho, W, C)
    return (rows[:, :, x0, :] * (1.0 - fx)[None, None, :, None]
            + rows[:, :, x1, :] * fx[None, None, :, None])       # (N, Ho, Wo, C)


@partial(jax.jit, static_argnames=("scale_factor", "tile_rows"))
def upconv_forward(x_nchw, weight, scale_factor=2, tile_rows=16):
    """UpConv forward.  x_nchw: (N, in_ch, H, W) f32; weight: (out_ch, in_ch, 2, 2)."""
    x_nchw = x_nchw.astype(jnp.float32)
    n, c, h, w = x_nchw.shape
    o = weight.shape[0]
    ho, wo = h * scale_factor, w * scale_factor

    opad = _round_up(o, 128)
    wp = _round_up(wo + 1, 8)
    vmem_limit = _pick_vmem_limit()

    # Row tiling: TH output rows per grid step; Ho padded to a multiple of TH so
    # no divisor search / tiny tiles for awkward Ho.  TH auto-shrinks to respect
    # the per-generation VMEM budget (double-buffered inputs/outputs + weights).
    th = max(2, min(tile_rows, ho))

    def _blk_bytes(t):
        in_b = (t + 1) * wp * c * 2            # body + halo blocks, bf16
        out_b = t * wo * opad * 4              # output block, f32
        return 2 * in_b + 2 * out_b + 4 * c * opad * 2 + out_b

    while th > 2 and _blk_bytes(th) > int(0.6 * vmem_limit):
        th = max(2, th // 2)
    ho_pad = _round_up(ho, th)

    # --- glue (fused by XLA under jit): NCHW->NHWC at ORIGINAL resolution,
    # bilinear upsample (align_corners), pad bottom/right + row tail, cast bf16.
    # TODO(synk): fold the bilinear upsample + pad into the kernel itself (DMA
    # original-resolution rows with a 1-row halo and interpolate in VMEM) so the
    # 4x-pixel upsampled tensor is never written to / read back from HBM.
    x_nhwc = jnp.transpose(x_nchw, (0, 2, 3, 1))                 # (N, H, W, C)
    x_up = _bilinear_upsample_nhwc_align_corners(x_nhwc, scale_factor)
    x_pad = jnp.pad(
        x_up, ((0, 0), (0, ho_pad - ho + 1), (0, wp - wo), (0, 0))
    ).astype(jnp.bfloat16)                                       # (N, Ho_pad+1, Wp, C)

    # Weights: (O, C, 2, 2) -> (4, C, Opad); tap k = kh*2 + kw; zero-padded
    # output channels keep the matmul N lane-dense.
    w_taps = jnp.transpose(weight.astype(jnp.float32), (2, 3, 1, 0)).reshape(4, c, o)
    w_mat = jnp.zeros((4, c, opad), jnp.float32).at[:, :, :o].set(w_taps)
    w_mat = w_mat.astype(jnp.bfloat16)

    grid = (n, ho_pad // th)
    flops = 2 * n * ho_pad * wo * (4 * c) * o
    bytes_accessed = int(x_pad.size * 2 + w_mat.size * 2
                         + n * ho_pad * wo * opad * 4)

    out_padded = pl.pallas_call(
        _upconv_kernel,
        out_shape=jax.ShapeDtypeStruct((n, ho_pad, wo, opad), jnp.float32),
        grid_spec=pltpu.PrefetchScalarGridSpec(
            num_scalar_prefetch=0,
            grid=grid,
            in_specs=[
                # body rows [r*TH, r*TH+TH)
                pl.BlockSpec((1, th, wp, c), lambda b, r: (b, r, 0, 0)),
                # halo row r*TH+TH (1-row blocks -> block index == row index)
                pl.BlockSpec((1, 1, wp, c), lambda b, r: (b, (r + 1) * th, 0, 0)),
                # per-tap weights, resident across the grid
                pl.BlockSpec((4, c, opad), lambda b, r: (0, 0, 0)),
            ],
            out_specs=pl.BlockSpec((1, th, wo, opad), lambda b, r: (b, r, 0, 0)),
        ),
        compiler_params=pltpu.CompilerParams(
            dimension_semantics=("parallel", "parallel"),
            vmem_limit_bytes=vmem_limit),
        cost_estimate=pl.CostEstimate(flops=flops, transcendentals=0,
                                      bytes_accessed=bytes_accessed),
    )(x_pad, x_pad, w_mat)

    # Drop row/lane padding and return NCHW like the PyTorch module; under jit
    # the slice + cast + transpose fuse into a single output pass.
    return jnp.transpose(out_padded[:, :ho, :, :o], (0, 3, 1, 2))


if __name__ == "__main__":
    key = jax.random.PRNGKey(0)
    kx, kw = jax.random.split(key)

    N, in_ch, H, W = 2, 4, 16, 16
    out_ch = 8
    scale = 2

    x = jax.random.normal(kx, (N, in_ch, H, W), jnp.float32)
    # deterministic init for Conv2d(in_ch, out_ch, 2, bias=False) (Kaiming-uniform-like)
    fan_in = in_ch * 2 * 2
    bound = (1.0 / fan_in) ** 0.5
    weight = jax.random.uniform(kw, (out_ch, in_ch, 2, 2), jnp.float32, -bound, bound)

    out = upconv_forward(x, weight, scale_factor=scale)
    out = jax.block_until_ready(out)

    # Reference: same preprocessing in f32, then lax.conv + ReLU (module semantics).
    x_nhwc = jnp.transpose(x, (0, 2, 3, 1))
    x_up = _bilinear_upsample_nhwc_align_corners(x_nhwc, scale)
    x_pad = jnp.pad(x_up, ((0, 0), (0, 1), (0, 1), (0, 0)))
    ref = lax.conv_general_dilated(
        x_pad, jnp.transpose(weight, (2, 3, 1, 0)), window_strides=(1, 1),
        padding="VALID", dimension_numbers=("NHWC", "HWIO", "NHWC"))
    ref = jnp.transpose(jnp.maximum(ref, 0.0), (0, 3, 1, 2))

    assert out.shape == (N, out_ch, scale * H, scale * W), out.shape
    # bf16 matmul inputs vs f32 reference -> loose but bug-catching tolerance.
    err = float(jnp.max(jnp.abs(out - ref)))
    assert jnp.allclose(out, ref, rtol=5e-2, atol=5e-2), err
    print("KERNEL_OK")
</pallas_src>

<mosaic_0001>
module attributes {stable_mosaic.version = 11 : i64} {
  func.func @_upconv_kernel(%arg0: i32, %arg1: i32, %arg2: memref<1x16x40x4xbf16, #tpu.memory_space<vmem>>, %arg3: memref<1x1x40x4xbf16, #tpu.memory_space<vmem>>, %arg4: memref<4x4x128xbf16, #tpu.memory_space<vmem>>, %arg5: memref<1x16x32x128xf32, #tpu.memory_space<vmem>>) attributes {dimension_semantics = [#tpu.dimension_semantics<parallel>, #tpu.dimension_semantics<parallel>], iteration_bounds = array<i64: 2, 2>, scalar_prefetch = 0 : i64, scratch_operands = 0 : i64, tpu.core_type = #tpu.core_type<tc>, window_params = [{transform_indices = @transform_0, window_bounds = array<i64: 1, 16, 40, 4>}, {transform_indices = @transform_1, window_bounds = array<i64: 1, 1, 40, 4>}, {pipeline_mode = #tpu.pipeline_mode<synchronous>, transform_indices = @transform_2, window_bounds = array<i64: 4, 4, 128>}, {transform_indices = @transform_3, window_bounds = array<i64: 1, 16, 32, 128>}]} {
    %c0 = arith.constant 0 : index
    %c0_0 = arith.constant 0 : index
    %c0_1 = arith.constant 0 : index
    %c0_2 = arith.constant 0 : index
    %0 = vector.load %arg2[%c0, %c0_0, %c0_1, %c0_2] : memref<1x16x40x4xbf16, #tpu.memory_space<vmem>>, vector<1x16x40x4xbf16>
    %1 = vector.shape_cast %0 : vector<1x16x40x4xbf16> to vector<16x40x4xbf16>
    %c0_3 = arith.constant 0 : index
    %c0_4 = arith.constant 0 : index
    %c0_5 = arith.constant 0 : index
    %c0_6 = arith.constant 0 : index
    %2 = vector.load %arg3[%c0_3, %c0_4, %c0_5, %c0_6] : memref<1x1x40x4xbf16, #tpu.memory_space<vmem>>, vector<1x1x40x4xbf16>
    %3 = vector.shape_cast %2 : vector<1x1x40x4xbf16> to vector<1x40x4xbf16>
    %4 = vector.extract_strided_slice %1 {offsets = [0, 0, 0], sizes = [16, 32, 4], strides = [1, 1, 1]} : vector<16x40x4xbf16> to vector<16x32x4xbf16>
    %5 = vector.extract_strided_slice %1 {offsets = [0, 1, 0], sizes = [16, 32, 4], strides = [1, 1, 1]} : vector<16x40x4xbf16> to vector<16x32x4xbf16>
    %6 = vector.extract_strided_slice %3 {offsets = [0, 0, 0], sizes = [1, 32, 4], strides = [1, 1, 1]} : vector<1x40x4xbf16> to vector<1x32x4xbf16>
    %7 = vector.extract_strided_slice %3 {offsets = [0, 1, 0], sizes = [1, 32, 4], strides = [1, 1, 1]} : vector<1x40x4xbf16> to vector<1x32x4xbf16>
    %c0_7 = arith.constant 0 : index
    %c0_8 = arith.constant 0 : index
    %c0_9 = arith.constant 0 : index
    %8 = vector.load %arg4[%c0_7, %c0_8, %c0_9] : memref<4x4x128xbf16, #tpu.memory_space<vmem>>, vector<1x4x128xbf16>
    %9 = vector.shape_cast %8 : vector<1x4x128xbf16> to vector<4x128xbf16>
    %c1 = arith.constant 1 : index
    %c0_10 = arith.constant 0 : index
    %c0_11 = arith.constant 0 : index
    %10 = vector.load %arg4[%c1, %c0_10, %c0_11] : memref<4x4x128xbf16, #tpu.memory_space<vmem>>, vector<1x4x128xbf16>
    %11 = vector.shape_cast %10 : vector<1x4x128xbf16> to vector<4x128xbf16>
    %c2 = arith.constant 2 : index
    %c0_12 = arith.constant 0 : index
    %c0_13 = arith.constant 0 : index
    %12 = vector.load %arg4[%c2, %c0_12, %c0_13] : memref<4x4x128xbf16, #tpu.memory_space<vmem>>, vector<1x4x128xbf16>
    %13 = vector.shape_cast %12 : vector<1x4x128xbf16> to vector<4x128xbf16>
    %c3 = arith.constant 3 : index
    %c0_14 = arith.constant 0 : index
    %c0_15 = arith.constant 0 : index
    %14 = vector.load %arg4[%c3, %c0_14, %c0_15] : memref<4x4x128xbf16, #tpu.memory_space<vmem>>, vector<1x4x128xbf16>
    %15 = vector.shape_cast %14 : vector<1x4x128xbf16> to vector<4x128xbf16>
    %16 = vector.extract_strided_slice %4 {offsets = [0, 0, 0], sizes = [15, 32, 4], strides = [1, 1, 1]} : vector<16x32x4xbf16> to vector<15x32x4xbf16>
    %17 = vector.shape_cast %16 : vector<15x32x4xbf16> to vector<480x4xbf16>
    %cst = arith.constant dense<0.000000e+00> : vector<480x128xf32>
    %18 = tpu.matmul %17, %9, %cst {dimension_numbers = #tpu.dot_dimension_numbers<[1], [0], [0], [1], [0, 0, 1, 1], [], []>} : vector<480x4xbf16>, vector<4x128xbf16>, vector<480x128xf32> -> vector<480x128xf32>
    %19 = vector.extract_strided_slice %5 {offsets = [0, 0, 0], sizes = [15, 32, 4], strides = [1, 1, 1]} : vector<16x32x4xbf16> to vector<15x32x4xbf16>
    %20 = vector.shape_cast %19 : vector<15x32x4xbf16> to vector<480x4xbf16>
    %cst_16 = arith.constant dense<0.000000e+00> : vector<480x128xf32>
    %21 = tpu.matmul %20, %11, %cst_16 {dimension_numbers = #tpu.dot_dimension_numbers<[1], [0], [0], [1], [0, 0, 1, 1], [], []>} : vector<480x4xbf16>, vector<4x128xbf16>, vector<480x128xf32> -> vector<480x128xf32>
    %22 = arith.addf %18, %21 : vector<480x128xf32>
    %23 = vector.extract_strided_slice %4 {offsets = [1, 0, 0], sizes = [15, 32, 4], strides = [1, 1, 1]} : vector<16x32x4xbf16> to vector<15x32x4xbf16>
    %24 = vector.shape_cast %23 : vector<15x32x4xbf16> to vector<480x4xbf16>
    %cst_17 = arith.constant dense<0.000000e+00> : vector<480x128xf32>
    %25 = tpu.matmul %24, %13, %cst_17 {dimension_numbers = #tpu.dot_dimension_numbers<[1], [0], [0], [1], [0, 0, 1, 1], [], []>} : vector<480x4xbf16>, vector<4x128xbf16>, vector<480x128xf32> -> vector<480x128xf32>
    %26 = arith.addf %22, %25 : vector<480x128xf32>
    %27 = vector.extract_strided_slice %5 {offsets = [1, 0, 0], sizes = [15, 32, 4], strides = [1, 1, 1]} : vector<16x32x4xbf16> to vector<15x32x4xbf16>
    %28 = vector.shape_cast %27 : vector<15x32x4xbf16> to vector<480x4xbf16>
    %cst_18 = arith.constant dense<0.000000e+00> : vector<480x128xf32>
    %29 = tpu.matmul %28, %15, %cst_18 {dimension_numbers = #tpu.dot_dimension_numbers<[1], [0], [0], [1], [0, 0, 1, 1], [], []>} : vector<480x4xbf16>, vector<4x128xbf16>, vector<480x128xf32> -> vector<480x128xf32>
    %30 = arith.addf %26, %29 : vector<480x128xf32>
    %cst_19 = arith.constant 0.000000e+00 : f32
    %31 = vector.broadcast %cst_19 : f32 to vector<480x128xf32>
    %32 = arith.maximumf %30, %31 : vector<480x128xf32>
    %33 = vector.shape_cast %32 : vector<480x128xf32> to vector<15x32x128xf32>
    %c0_20 = arith.constant 0 : index
    %c0_21 = arith.constant 0 : index
    %c0_22 = arith.constant 0 : index
    %c0_23 = arith.constant 0 : index
    %34 = vector.load %arg5[%c0_20, %c0_21, %c0_22, %c0_23] : memref<1x16x32x128xf32, #tpu.memory_space<vmem>>, vector<1x15x32x128xf32>
    %35 = vector.shape_cast %34 : vector<1x15x32x128xf32> to vector<15x32x128xf32>
    %36 = vector.shape_cast %33 : vector<15x32x128xf32> to vector<1x15x32x128xf32>
    tpu.vector_store %arg5[%c0_20, %c0_21, %c0_22, %c0_23], %36 {strides = array<i32>} : memref<1x16x32x128xf32, #tpu.memory_space<vmem>>, vector<1x15x32x128xf32>,
    %37 = vector.extract_strided_slice %4 {offsets = [15, 0, 0], sizes = [1, 32, 4], strides = [1, 1, 1]} : vector<16x32x4xbf16> to vector<1x32x4xbf16>
    %38 = vector.shape_cast %37 : vector<1x32x4xbf16> to vector<32x4xbf16>
    %cst_24 = arith.constant dense<0.000000e+00> : vector<32x128xf32>
    %39 = tpu.matmul %38, %9, %cst_24 {dimension_numbers = #tpu.dot_dimension_numbers<[1], [0], [0], [1], [0, 0, 1, 1], [], []>} : vector<32x4xbf16>, vector<4x128xbf16>, vector<32x128xf32> -> vector<32x128xf32>
    %40 = vector.extract_strided_slice %5 {offsets = [15, 0, 0], sizes = [1, 32, 4], strides = [1, 1, 1]} : vector<16x32x4xbf16> to vector<1x32x4xbf16>
    %41 = vector.shape_cast %40 : vector<1x32x4xbf16> to vector<32x4xbf16>
    %cst_25 = arith.constant dense<0.000000e+00> : vector<32x128xf32>
    %42 = tpu.matmul %41, %11, %cst_25 {dimension_numbers = #tpu.dot_dimension_numbers<[1], [0], [0], [1], [0, 0, 1, 1], [], []>} : vector<32x4xbf16>, vector<4x128xbf16>, vector<32x128xf32> -> vector<32x128xf32>
    %43 = arith.addf %39, %42 : vector<32x128xf32>
    %44 = vector.shape_cast %6 : vector<1x32x4xbf16> to vector<32x4xbf16>
    %cst_26 = arith.constant dense<0.000000e+00> : vector<32x128xf32>
    %45 = tpu.matmul %44, %13, %cst_26 {dimension_numbers = #tpu.dot_dimension_numbers<[1], [0], [0], [1], [0, 0, 1, 1], [], []>} : vector<32x4xbf16>, vector<4x128xbf16>, vector<32x128xf32> -> vector<32x128xf32>
    %46 = arith.addf %43, %45 : vector<32x128xf32>
    %47 = vector.shape_cast %7 : vector<1x32x4xbf16> to vector<32x4xbf16>
    %cst_27 = arith.constant dense<0.000000e+00> : vector<32x128xf32>
    %48 = tpu.matmul %47, %15, %cst_27 {dimension_numbers = #tpu.dot_dimension_numbers<[1], [0], [0], [1], [0, 0, 1, 1], [], []>} : vector<32x4xbf16>, vector<4x128xbf16>, vector<32x128xf32> -> vector<32x128xf32>
    %49 = arith.addf %46, %48 : vector<32x128xf32>
    %cst_28 = arith.constant 0.000000e+00 : f32
    %50 = vector.broadcast %cst_28 : f32 to vector<32x128xf32>
    %51 = arith.maximumf %49, %50 : vector<32x128xf32>
    %52 = vector.shape_cast %51 : vector<32x128xf32> to vector<1x32x128xf32>
    %c0_29 = arith.constant 0 : index
    %c15 = arith.constant 15 : index
    %c0_30 = arith.constant 0 : index
    %c0_31 = arith.constant 0 : index
    %53 = vector.load %arg5[%c0_29, %c15, %c0_30, %c0_31] : memref<1x16x32x128xf32, #tpu.memory_space<vmem>>, vector<1x1x32x128xf32>
    %54 = vector.shape_cast %53 : vector<1x1x32x128xf32> to vector<1x32x128xf32>
    %55 = vector.shape_cast %52 : vector<1x32x128xf32> to vector<1x1x32x128xf32>
    tpu.vector_store %arg5[%c0_29, %c15, %c0_30, %c0_31], %55 {strides = array<i32>} : memref<1x16x32x128xf32, #tpu.memory_space<vmem>>, vector<1x1x32x128xf32>,
    return
  }
  func.func @transform_0(%arg0: i32, %arg1: i32) -> (i32, i32, i32, i32) {
    %c0_i32 = arith.constant 0 : i32
    %c0_i32_0 = arith.constant 0 : i32
    %c0_i32_1 = arith.constant 0 : i32
    return %arg0, %arg1, %c0_i32, %c0_i32_0 : i32, i32, i32, i32
  }
  func.func @transform_1(%arg0: i32, %arg1: i32) -> (i32, i32, i32, i32) {
    %c1_i32 = arith.constant 1 : i32
    %0 = arith.addi %arg1, %c1_i32 : i32
    %c16_i32 = arith.constant 16 : i32
    %1 = arith.muli %0, %c16_i32 : i32
    %c0_i32 = arith.constant 0 : i32
    %c0_i32_0 = arith.constant 0 : i32
    %c0_i32_1 = arith.constant 0 : i32
    return %arg0, %1, %c0_i32, %c0_i32_0 : i32, i32, i32, i32
  }
  func.func @transform_2(%arg0: i32, %arg1: i32) -> (i32, i32, i32) {
    %c0_i32 = arith.constant 0 : i32
    %c0_i32_0 = arith.constant 0 : i32
    %c0_i32_1 = arith.constant 0 : i32
    %c0_i32_2 = arith.constant 0 : i32
    return %c0_i32, %c0_i32_0, %c0_i32_1 : i32, i32, i32
  }
  func.func @transform_3(%arg0: i32, %arg1: i32) -> (i32, i32, i32, i32) {
    %c0_i32 = arith.constant 0 : i32
    %c0_i32_0 = arith.constant 0 : i32
    %c0_i32_1 = arith.constant 0 : i32
    return %arg0, %arg1, %c0_i32, %c0_i32_0 : i32, i32, i32, i32
  }
}

</mosaic_0001>

<bundles_post_ra>
// kernel: upconv_forward.1
= control target key start
LH: loop header
LB: loop body
LE: loop exit
PB: predicated region body
PF: predicated region fallthrough
CT: control target
= control target key end

     0   :  { %s4265_s12 = smov 0   ;;  %s4267_s13 = smov 0   ;;  %s5076_s0 = inlined_call_operand.vmem [shape: bf16[2,33,40,4], index: 0, kind: input, shape index: {}, may-alias: {0,1}]   ;;  %s5077_s1 = inlined_call_operand.vmem [shape: bf16[2,33,40,4], index: 1, kind: input, shape index: {}, may-alias: {0,1}]   ;;  %s5078_s2 = inlined_call_operand.vmem [shape: bf16[4,4,128], index: 2, kind: input, shape index: {}]   ;;  %s5079_s3 = inlined_call_operand.vmem [shape: f32[2,32,32,128], index: 3, kind: output, shape index: {}]  }
   0x1   :  { %s4269_s14 = smov 0   ;;  %s4271_s15 = smov 0  }
   0x2   :  { %s4273_s16 = smov 0  }
   0x3 LB: > { %s22_s17 = sadd.s32 1, %s4235_s14  ;;  %s25_s18 = sadd.s32 1, %s4239_s15  ;;  %s4243_s16 = sphi %s4273_s16, %s13_s16   ;;  %s4239_s15 = sphi %s4271_s15, %s5146_s15   ;;  %s4235_s14 = sphi %s4269_s14, %s5145_s14   ;;  %s4231_s13 = sphi %s4267_s13, %s5144_s13   ;;  %s4227_s12 = sphi %s4265_s12, %s5143_s12  }
   0x4   : > { %p23_p0 = scmp.ge.s32.totalorder %s22_s17, 2  ;;  %p3292_p1 = scmp.ge.s32.totalorder %s4243_s16, 1 }
   0x5   : > { %p193_p2 = scmp.lt.s32.totalorder %s4243_s16, 5 }
   0x6   : > { %s5148_s17 = smov (%p23_p0, %s22_s17), 0  ;;  %s5150_s18 = smov (!%p23_p0, %s25_s18), %s4239_s15 }
   0x7   : > { %p194_p3 = pnand %p3292_p1, %p193_p2  ;;  %p27_p4 = scmp.ge.s32.totalorder %s5150_s18, 2 }
   0x9   : > { %s5152_s18 = smov (%p27_p4, %s5150_s18), 0  ;;  %197 = sbr.rel (%p194_p3) target bundleno = 527 (0x20f), region = 32 }
  0x10   : > { %v374_v0 = vld [vmem:[%s5078_s2] sm:$0x3]  ;;  %vm1225_vm0 = vcmask 1041408   ;;  %s4298_s21 = sshll.u32 %s4227_s12, 4  ;;  %p249_p5 = scmp.lt.s32.totalorder %s4231_s13, 1  ;;  %vm1134_vm1 = vcmask 31744  }
  0x11   : > { %4115 = vmatprep.subr.msk.bf16.mxu0 %vm1225_vm0, %v374_v0  ;;  %v4302_v1 = vsel %vm1225_vm0, %v374_v0, 0  ;;  %p251_p6 = scmp.lt.s32.totalorder %s4298_s21, 32  ;;  %v4308_v2 = vld [vmem:[%s5078_s2 + $0x2] sm:$0x3]  ;;  %v3302_v4 = vld [vmem:[%s5078_s2 + $0x4] sm:$0x3] }
  0x12   : > { %5101 = vst [vmem:[#allocation2_spill] sm:$0xff] %v4302_v1  ;;  %3711 = vmatpush3.bf16.msra.mxu0 %v4302_v1  ;;  %s5154_s13 = smov (!%p249_p5, %s4231_s13), 1  ;;  %4114 = vmatprep.subr.msk.bf16.mxu1 %vm1225_vm0, %v4308_v2  ;;  %v4317_v3 = vsel %vm1225_vm0, %v4308_v2, 0  ;;  %v3303_v5 = vld [vmem:[%s5078_s2 + $0x6] sm:$0x3]  ;;  %v4338_v6 = vsel %vm1225_vm0, %v3302_v4, 0 }
  0x13   : > { %s252_s26 = scalar_select %p251_p6, %s4298_s21, 32  ;;  %3649 = vmatpush3.bf16.msra.mxu1 %v4317_v3  ;;  %4117 = vmatprep.subr.msk.bf16.mxu0 %vm1225_vm0, %v3302_v4  ;;  %vm381_vm2 = vsmask.f32 3328  ;;  %vm382_vm3 = vsmask.f32 7440  ;;  %5102 = vst [vmem:[#allocation3_spill] sm:$0xff] %v4338_v6 }
  0x14   : > { %s4124_s27 = smul.u32 165, %s5154_s13  ;;  %4116 = vmatprep.subr.msk.bf16.mxu1 %vm1225_vm0, %v374_v0  ;;  %v4341_v7 = vsel %vm1225_vm0, %v3303_v5, 0  ;;  %vm4356_vm4 = vmor %vm381_vm2, %vm382_vm3  ;;  %s3511_s9 = sadd.s32 16, %s4298_s21  ;;  %v4202_v37 = vld [vmem:[%s5078_s2] sm:$0x3] }
  0x15   : > { %s4123_s28 = smul.u32 5, %s252_s26  ;;  %5103 = vst [vmem:[#allocation4_spill] sm:$0xff] %v4341_v7  ;;  %p268_p7 = scmp.lt.s32.totalorder %s3511_s9, 32  ;;  %vm2885_vm5 = vsmask.f32 7424 }
  0x16   : > { %p280_p8 = scmp.lt.s32.totalorder %s4298_s21, 31  ;;  %s3299_s30 = sshll.u32 %s5154_s13, 7 }
  0x17   : > { %s255_s4 = sadd.s32 %s4124_s27, %s4123_s28  ;;  %s5156_s9 = smov (!%p268_p7, %s3511_s9), 32 }
  0x18   : > { %s3294_s5 = sshll.u32 %s255_s4, 2  ;;  %s4125_s10 = smul.u32 5, %s5156_s9 }
  0x19   : > { %s4335_s8 = scalar_lea.vmem %s5076_s0, %s3294_s5  ;;  %s5158_s21 = smov (!%p280_p8, %s4298_s21), 31 }
  0x1a   : > { %v289_v8 = vld [vmem:[%s4335_s8] sm:$0xf]  ;;  %v290_v9 = vld [vmem:[%s4335_s8 + $0x4] sm:$0xf]  ;;  %v291_v10 = vld [vmem:[%s4335_s8 + $0x8] sm:$0xf]  ;;  %s272_s11 = sadd.s32 %s4125_s10, %s4124_s27 }
  0x1b   : > { %v385_v11 = vshrl.u32 %v289_v8, 16  ;;  %v388_v12 = vshll.u32 %v289_v8, 16  ;;  %v394_v13 = vshll.u32 %v290_v9, 16  ;;  %v398_v14 = vshrl.u32 %v290_v9, 16  ;;  %v292_v15 = vld [vmem:[%s4335_s8 + $0xc] sm:$0xf] }
  0x1c   : > { %v3364_v16 = vcombine.low %v289_v8, %v290_v9  ;;  %v414_v17 = vshll.u32 %v292_v15, 16  ;;  %v418_v18 = vshrl.u32 %v292_v15, 16  ;;  %v3365_v19 = vcombine.low %v291_v10, %v292_v15  ;;  %v294_v20 = vld [vmem:[%s4335_s8 + $0x14] sm:$0xf]  ;;  %v295_v21 = vld [vmem:[%s4335_s8 + $0x18] sm:$0xf] }
  0x1d   : > { %v387_v22 = vrot.slane %v385_v11, 4  ;;  %v390_v23 = vrot.slane %v388_v12, 5  ;;  %v396_v24 = vrot.slane %v394_v13, 5  ;;  %v400_v25 = vrot.slane %v398_v14, 4  ;;  %v296_v34 = vld [vmem:[%s4335_s8 + $0x1c] sm:$0xf] }
  0x1e   : > { %3712 = vmatprep.mubr.msk.bf16.mxu0 %vm1134_vm1, %v3364_v16  ;;  %v4350_v26 = vrot.slane %v414_v17, 5  ;;  %v420_v27 = vrot.slane %v418_v18, 4  ;;  %v429_v28 = vshrl.u32 %v294_v20, 16  ;;  %v432_v29 = vshll.u32 %v294_v20, 16  ;;  %v297_v40 = vld [vmem:[%s4335_s8 + $0x20] sm:$0xf] }
  0x1f   : > { %3713 = vmatmul.mubr.msk.bf16.vlgmr.msra.gmra.mrb[0].mxu0 %vm1134_vm1, %v3365_v19  ;;  %v438_v30 = vshll.u32 %v295_v21, 16  ;;  %v442_v31 = vshrl.u32 %v295_v21, 16  ;;  %v3366_v32 = vcombine.low %v294_v20, %v295_v21  ;;  %v391_v33 = vor.u32 %v390_v23, %v387_v22  ;;  %v293_v53 = vld [vmem:[%s4335_s8 + $0x10] sm:$0xf]  ;;  %v298_v58 = vld [vmem:[%s4335_s8 + $0x24] sm:$0xf] }
  0x20   : > { %v431_v35 = vrot.slane %v429_v28, 4  ;;  %v434_v36 = vrot.slane %v432_v29, 5  ;;  %v401_v38 = vor.u32 %v400_v25, %v396_v24  ;;  %v404_v39 = vshll.u32 %v291_v10, 16  ;;  %3773 = vmatpush3.bf16.msra.mxu0 %v4338_v6  ;;  %v299_v12 = vld [vmem:[%s4335_s8 + $0x28] sm:$0xf]  ;;  %s3296_s12 = sshll.u32 %s272_s11, 2 }
  0x21   : > { %v440_v41 = vrot.slane %v438_v30, 5  ;;  %v444_v42 = vrot.slane %v442_v31, 4  ;;  %3716 = vmatprep.mubr.msk.bf16.mxu0 %vm1134_vm1, %v3366_v32  ;;  %v392_v43 = vrot.slane %v391_v33, 4  ;;  %v408_v44 = vshrl.u32 %v291_v10, 16  ;;  %4118 = vmatprep.subr.msk.bf16.mxu0 %vm1225_vm0, %v3303_v5  ;;  %v300_v21 = vld [vmem:[%s4335_s8 + $0x2c] sm:$0xf]  ;;  %s4812_s22 = scalar_lea.vmem %s5077_s1, %s3296_s12 }
  0x22   : > { %v402_v45 = vrot.slane %v401_v38, 4  ;;  %v406_v46 = vrot.slane %v404_v39, 5  ;;  %v448_v47 = vshll.u32 %v296_v34, 16  ;;  %v452_v48 = vshrl.u32 %v296_v34, 16  ;;  %v302_v28 = vld [vmem:[%s4335_s8 + $0x34] sm:$0xf] }
  0x23   : > { %v397_v49 = vsel %vm4356_vm4, %v392_v43, %v396_v24  ;;  %v410_v50 = vrot.slane %v408_v44, 4  ;;  %v458_v51 = vshll.u32 %v297_v40, 16  ;;  %v462_v52 = vshrl.u32 %v297_v40, 16  ;;  %s3298_s29 = sshll.u32 %s5158_s21, 2 }
  0x24   : > { %v407_v54 = vsel %vm4356_vm4, %v402_v45, %v406_v46  ;;  %v450_v55 = vrot.slane %v448_v47, 5  ;;  %v454_v56 = vrot.slane %v452_v48, 4  ;;  %v3367_v57 = vcombine.low %v296_v34, %v297_v40  ;;  %v305_v47 = vld [vmem:[%s4335_s8 + $0x40] sm:$0xf]  ;;  %s284_s4 = sadd.s32 %s3299_s30, %s3298_s29 }
  0x25   : > { %v411_v59 = vor.u32 %v410_v50, %v406_v46  ;;  %v3304_v60 = vcombine.low %v397_v49, %v407_v54  ;;  %v460_v61 = vrot.slane %v458_v51, 5  ;;  %v464_v62 = vrot.slane %v462_v52, 4  ;;  %s3300_s5 = sshll.u32 %s284_s4, 3 }
  0x26   : > { %v421_v63 = vor.u32 %v420_v27, %v4350_v26  ;;  %v424_v0 = vshll.u32 %v293_v53, 16  ;;  %v435_v4 = vor.u32 %v434_v36, %v431_v35  ;;  %v445_v5 = vor.u32 %v444_v42, %v440_v41  ;;  %v301_v27 = vld [vmem:[%s4335_s8 + $0x30] sm:$0xf]  ;;  %v303_v36 = vld [vmem:[%s4335_s8 + $0x38] sm:$0xf] }
  0x27   : > { %v412_v8 = vrot.slane %v411_v59, 4  ;;  %3650 = vmatprep.mubr.msk.bf16.mxu1 %vm1134_vm1, %v3304_v60  ;;  %3717 = vmatmul.mubr.msk.bf16.gmra.mrb[4].mxu0 %vm1134_vm1, %v3367_v57  ;;  %v455_v9 = vor.u32 %v454_v56, %v450_v55  ;;  %v465_v10 = vor.u32 %v464_v62, %v460_v61  ;;  %v468_v11 = vshll.u32 %v298_v58, 16  ;;  %v304_v42 = vld [vmem:[%s4335_s8 + $0x3c] sm:$0xf] }
  0x28   : > { %v422_v13 = vrot.slane %v421_v63, 4  ;;  %v426_v14 = vrot.slane %v424_v0, 5  ;;  %3774 = vmatprep.mubr.msk.bf16.mxu0 %vm1134_vm1, %v3366_v32  ;;  %v436_v15 = vrot.slane %v435_v4, 4  ;;  %v446_v16 = vrot.slane %v445_v5, 4  ;;  %v306_v0 = vld [vmem:[%s4335_s8 + $0x44] sm:$0xf] }
  0x29   : > { %v417_v17 = vsel %vm4356_vm4, %v412_v8, %v4350_v26  ;;  %v456_v18 = vrot.slane %v455_v9, 4  ;;  %v466_v19 = vrot.slane %v465_v10, 4  ;;  %v470_v20 = vrot.slane %v468_v11, 5  ;;  %v307_v9 = vld [vmem:[%s4335_s8 + $0x48] sm:$0xf] }
  0x2a   : > { %v427_v22 = vsel %vm4356_vm4, %v422_v13, %v426_v14  ;;  %v441_v23 = vsel %vm4356_vm4, %v436_v15, %v440_v41  ;;  %v451_v24 = vsel %vm4356_vm4, %v446_v16, %v450_v55  ;;  %v473_v25 = vshrl.u32 %v299_v12, 16 }
  0x2b   : > { %v3305_v29 = vcombine.low %v417_v17, %v427_v22  ;;  %v4387_v26 = vcombine.low %v441_v23, %v451_v24  ;;  %v461_v30 = vsel %vm4356_vm4, %v456_v18, %v460_v61  ;;  %v471_v31 = vsel %vm4356_vm4, %v466_v19, %v470_v20  ;;  %v308_v22 = vld [vmem:[%s4335_s8 + $0x4c] sm:$0xf]  ;;  %v309_v23 = vld [vmem:[%s4335_s8 + $0x50] sm:$0xf] }
  0x2c   : > { %v4393_v32 = vcombine.low %v461_v30, %v471_v31  ;;  %v475_v33 = vrot.slane %v473_v25, 4  ;;  %v476_v34 = vshll.u32 %v299_v12, 16  ;;  %v482_v35 = vshll.u32 %v300_v21, 16 }
  0x2d   : > { %3651 = vmatmul.mubr.msk.bf16.vlgmr.msra.gmra.mrb[0].mxu1 %vm1134_vm1, %v3305_v29  ;;  %v486_v38 = vshrl.u32 %v300_v21, 16  ;;  %v4397_v39 = vcombine.low %v299_v12, %v300_v21  ;;  %v492_v40 = vshll.u32 %v301_v27, 16  ;;  %v502_v41 = vshll.u32 %v302_v28, 16  ;;  %v310_v29 = vld [vmem:[%s4335_s8 + $0x54] sm:$0xf] }
  0x2e   : > { %3921 = vmatpush3.bf16.msra.mxu1 %v4302_v1  ;;  %3654 = vmatprep.mubr.msk.bf16.mxu1 %vm1134_vm1, %v4387_v26  ;;  %v478_v43 = vrot.slane %v476_v34, 5  ;;  %v484_v44 = vrot.slane %v482_v35, 5  ;;  %v506_v45 = vshrl.u32 %v302_v28, 16  ;;  %v4403_v46 = vcombine.low %v301_v27, %v302_v28 }
  0x2f   : > { %3775 = vmatmul.mubr.msk.bf16.vlgmr.msra.gmra.mrb[0].mxu0 %vm1134_vm1, %v3367_v57  ;;  %v488_v48 = vrot.slane %v486_v38, 4  ;;  %v494_v49 = vrot.slane %v492_v40, 5  ;;  %v504_v50 = vrot.slane %v502_v41, 5  ;;  %v496_v51 = vshrl.u32 %v301_v27, 16  ;;  %4119 = vmatprep.subr.msk.bf16.mxu1 %vm1225_vm0, %v4308_v2 }
  0x30   : > { %3778 = vmatprep.mubr.msk.bf16.mxu0 %vm1134_vm1, %v4397_v39  ;;  %v479_v52 = vor.u32 %v478_v43, %v475_v33  ;;  %v508_v53 = vrot.slane %v506_v45, 4  ;;  %v512_v54 = vshll.u32 %v303_v36, 16  ;;  %v517_v55 = vshrl.u32 %v304_v42, 16  ;;  %3835 = vmatpush3.bf16.msra.mxu0 %v4341_v7  ;;  %v311_v45 = vld [vmem:[%s4335_s8 + $0x58] sm:$0xf] }
  0x31   : > { %v489_v56 = vor.u32 %v488_v48, %v484_v44  ;;  %v498_v57 = vrot.slane %v496_v51, 4  ;;  %v520_v58 = vshll.u32 %v304_v42, 16  ;;  %v526_v59 = vshll.u32 %v305_v47, 16  ;;  %v312_v51 = vld [vmem:[%s4335_s8 + $0x5c] sm:$0xf] }
  0x32   : > { %v480_v60 = vrot.slane %v479_v52, 4  ;;  %v509_v61 = vor.u32 %v508_v53, %v504_v50  ;;  %v514_v62 = vrot.slane %v512_v54, 5  ;;  %v519_v63 = vrot.slane %v517_v55, 4 }
  0x33   : > { %v490_v2 = vrot.slane %v489_v56, 4  ;;  %v499_v4 = vor.u32 %v498_v57, %v494_v49  ;;  %v522_v5 = vrot.slane %v520_v58, 5  ;;  %v528_v8 = vrot.slane %v526_v59, 5 }
  0x34   : > { %v485_v10 = vsel %vm4356_vm4, %v480_v60, %v484_v44  ;;  %v510_v11 = vrot.slane %v509_v61, 4  ;;  %v530_v12 = vshrl.u32 %v305_v47, 16  ;;  %v4416_v13 = vcombine.low %v304_v42, %v305_v47 }
  0x35   : > { %3655 = vmatmul.mubr.msk.bf16.gmra.mrb[4].mxu1 %vm1134_vm1, %v4393_v32  ;;  %v495_v14 = vsel %vm4356_vm4, %v490_v2, %v494_v49  ;;  %v500_v15 = vrot.slane %v499_v4, 4  ;;  %v523_v16 = vor.u32 %v522_v5, %v519_v63  ;;  %v536_v17 = vshll.u32 %v306_v0, 16 }
  0x36   : > { %v4422_v18 = vcombine.low %v485_v10, %v495_v14  ;;  %v515_v19 = vsel %vm4356_vm4, %v510_v11, %v514_v62  ;;  %v532_v20 = vrot.slane %v530_v12, 4  ;;  %v546_v21 = vshll.u32 %v307_v9, 16 }
  0x37   : > { %3779 = vmatmul.mubr.msk.bf16.gmra.mrb[4].mxu0 %vm1134_vm1, %v4403_v46  ;;  %v505_v24 = vsel %vm4356_vm4, %v500_v15, %v504_v50  ;;  %v524_v25 = vrot.slane %v523_v16, 4  ;;  %v538_v27 = vrot.slane %v536_v17, 5  ;;  %v550_v28 = vshrl.u32 %v307_v9, 16 }
  0x38   : > { %3658 = vmatprep.mubr.msk.bf16.mxu1 %vm1134_vm1, %v4422_v18  ;;  %v4435_v30 = vcombine.low %v505_v24, %v515_v19  ;;  %3782 = vmatprep.mubr.msk.bf16.mxu0 %vm1134_vm1, %v4416_v13  ;;  %v533_v31 = vor.u32 %v532_v20, %v528_v8  ;;  %v548_v33 = vrot.slane %v546_v21, 5  ;;  %v4439_v34 = vcombine.low %v306_v0, %v307_v9  ;;  %v314_v9 = vld [vmem:[%s4335_s8 + $0x64] sm:$0xf]  ;;  %v315_v20 = vld [vmem:[%s4335_s8 + $0x68] sm:$0xf] }
  0x39   : > { %v529_v35 = vsel %vm4356_vm4, %v524_v25, %v528_v8  ;;  %v552_v36 = vrot.slane %v550_v28, 4  ;;  %v540_v38 = vshrl.u32 %v306_v0, 16  ;;  %v556_v40 = vshll.u32 %v308_v22, 16  ;;  %v313_v8 = vld [vmem:[%s4335_s8 + $0x60] sm:$0xf] }
  0x3a   : > { %v534_v41 = vrot.slane %v533_v31, 4  ;;  %v561_v42 = vshrl.u32 %v309_v23, 16  ;;  %v564_v43 = vshll.u32 %v309_v23, 16  ;;  %v570_v44 = vshll.u32 %v310_v29, 16  ;;  %v316_v31 = vld [vmem:[%s4335_s8 + $0x6c] sm:$0xf] }
  0x3b   : > { %v542_v47 = vrot.slane %v540_v38, 4  ;;  %v553_v48 = vor.u32 %v552_v36, %v548_v33  ;;  %v558_v49 = vrot.slane %v556_v40, 5  ;;  %v574_v50 = vshrl.u32 %v310_v29, 16 }
  0x3c   : > { %v539_v52 = vsel %vm4356_vm4, %v534_v41, %v538_v27  ;;  %v563_v53 = vrot.slane %v561_v42, 4  ;;  %v566_v54 = vrot.slane %v564_v43, 5  ;;  %v572_v55 = vrot.slane %v570_v44, 5 }
  0x3d   : > { %3659 = vmatmul.mubr.msk.bf16.gmra.mrb[8].mxu1 %vm1134_vm1, %v4435_v30  ;;  %v4449_v56 = vcombine.low %v529_v35, %v539_v52  ;;  %v543_v57 = vor.u32 %v542_v47, %v538_v27  ;;  %v554_v58 = vrot.slane %v553_v48, 4  ;;  %v576_v59 = vrot.slane %v574_v50, 4  ;;  %v317_v35 = vld [vmem:[%s4335_s8 + $0x70] sm:$0xf] }
  0x3e   : > { %v4451_v60 = vcombine.low %v309_v23, %v310_v29  ;;  %v567_v61 = vor.u32 %v566_v54, %v563_v53  ;;  %v580_v62 = vshll.u32 %v311_v45, 16  ;;  %v590_v63 = vshll.u32 %v312_v51, 16  ;;  %v318_v54 = vld [vmem:[%s4335_s8 + $0x74] sm:$0xf] }
  0x3f   : > { %3662 = vmatprep.mubr.msk.bf16.mxu1 %vm1134_vm1, %v4449_v56  ;;  %3783 = vmatmul.mubr.msk.bf16.gmra.mrb[8].mxu0 %vm1134_vm1, %v4439_v34  ;;  %v544_v0 = vrot.slane %v543_v57, 4  ;;  %v559_v2 = vsel %vm4356_vm4, %v554_v58, %v558_v49  ;;  %v577_v4 = vor.u32 %v576_v59, %v572_v55  ;;  %v594_v5 = vshrl.u32 %v312_v51, 16 }
  0x40   : > { %3786 = vmatprep.mubr.msk.bf16.mxu0 %vm1134_vm1, %v4451_v60  ;;  %v568_v10 = vrot.slane %v567_v61, 4  ;;  %v582_v11 = vrot.slane %v580_v62, 5  ;;  %v592_v12 = vrot.slane %v590_v63, 5  ;;  %v4463_v14 = vcombine.low %v311_v45, %v312_v51 }
  0x41   : > { %v549_v15 = vsel %vm4356_vm4, %v544_v0, %v548_v33  ;;  %v578_v16 = vrot.slane %v577_v4, 4  ;;  %v596_v17 = vrot.slane %v594_v5, 4  ;;  %v584_v19 = vshrl.u32 %v311_v45, 16  ;;  %v320_v4 = vld [vmem:[%s4335_s8 + $0x7c] sm:$0xf] }
  0x42   : > { %v4468_v21 = vcombine.low %v549_v15, %v559_v2  ;;  %v573_v22 = vsel %vm4356_vm4, %v568_v10, %v572_v55  ;;  %v600_v23 = vshll.u32 %v313_v8, 16  ;;  %v605_v24 = vshrl.u32 %v314_v9, 16  ;;  %v319_v55 = vld [vmem:[%s4335_s8 + $0x78] sm:$0xf] }
  0x43   : > { %v583_v25 = vsel %vm4356_vm4, %v578_v16, %v582_v11  ;;  %v586_v27 = vrot.slane %v584_v19, 4  ;;  %v597_v28 = vor.u32 %v596_v17, %v592_v12  ;;  %v608_v29 = vshll.u32 %v314_v9, 16 }
  0x44   : > { %v4476_v33 = vcombine.low %v573_v22, %v583_v25  ;;  %v602_v36 = vrot.slane %v600_v23, 5  ;;  %v607_v38 = vrot.slane %v605_v24, 4  ;;  %v614_v40 = vshll.u32 %v315_v20, 16  ;;  %v321_v23 = vld [vmem:[%s4335_s8 + $0x80] sm:$0xf] }
  0x45   : > { %3663 = vmatmul.mubr.msk.bf16.gmra.mrb[12].mxu1 %vm1134_vm1, %v4468_v21  ;;  %v587_v41 = vor.u32 %v586_v27, %v582_v11  ;;  %v598_v42 = vrot.slane %v597_v28, 4  ;;  %v610_v43 = vrot.slane %v608_v29, 5  ;;  %v618_v44 = vshrl.u32 %v315_v20, 16  ;;  %v322_v29 = vld [vmem:[%s4335_s8 + $0x84] sm:$0xf] }
  0x46   : > { %3666 = vmatprep.mubr.msk.bf16.mxu1 %vm1134_vm1, %v4476_v33  ;;  %v616_v45 = vrot.slane %v614_v40, 5  ;;  %v4482_v47 = vcombine.low %v314_v9, %v315_v20  ;;  %v624_v48 = vshll.u32 %v316_v31, 16  ;;  %v634_v49 = vshll.u32 %v317_v35, 16 }
  0x47   : > { %3787 = vmatmul.mubr.msk.bf16.gmra.mrb[12].mxu0 %vm1134_vm1, %v4463_v14  ;;  %v588_v50 = vrot.slane %v587_v41, 4  ;;  %v603_v51 = vsel %vm4356_vm4, %v598_v42, %v602_v36  ;;  %v620_v52 = vrot.slane %v618_v44, 4  ;;  %v611_v53 = vor.u32 %v610_v43, %v607_v38 }
  0x48   : > { %3790 = vmatprep.mubr.msk.bf16.mxu0 %vm1134_vm1, %v4482_v47  ;;  %v626_v57 = vrot.slane %v624_v48, 5  ;;  %v636_v58 = vrot.slane %v634_v49, 5  ;;  %v638_v59 = vshrl.u32 %v317_v35, 16  ;;  %v4492_v61 = vcombine.low %v316_v31, %v317_v35 }
  0x49   : > { %v593_v62 = vsel %vm4356_vm4, %v588_v50, %v592_v12  ;;  %v612_v63 = vrot.slane %v611_v53, 4  ;;  %v621_v0 = vor.u32 %v620_v52, %v616_v45  ;;  %v628_v2 = vshrl.u32 %v316_v31, 16  ;;  %v323_v50 = vld [vmem:[%s4335_s8 + $0x88] sm:$0xf] }
  0x4a   : > { %v4497_v5 = vcombine.low %v593_v62, %v603_v51  ;;  %v640_v8 = vrot.slane %v638_v59, 4  ;;  %v644_v9 = vshll.u32 %v318_v54, 16  ;;  %v649_v10 = vshrl.u32 %v319_v55, 16  ;;  %v324_v51 = vld [vmem:[%s4335_s8 + $0x8c] sm:$0xf] }
  0x4b   : > { %v617_v11 = vsel %vm4356_vm4, %v612_v63, %v616_v45  ;;  %v622_v15 = vrot.slane %v621_v0, 4  ;;  %v630_v16 = vrot.slane %v628_v2, 4  ;;  %v652_v17 = vshll.u32 %v319_v55, 16 }
  0x4c   : > { %v641_v19 = vor.u32 %v640_v8, %v636_v58  ;;  %v646_v20 = vrot.slane %v644_v9, 5  ;;  %v651_v12 = vrot.slane %v649_v10, 4  ;;  %v658_v22 = vshll.u32 %v320_v4, 16 }
  0x4d   : > { %3667 = vmatmul.mubr.msk.bf16.gmra.mrb[16].mxu1 %vm1134_vm1, %v4497_v5  ;;  %v627_v24 = vsel %vm4356_vm4, %v622_v15, %v626_v57  ;;  %v631_v25 = vor.u32 %v630_v16, %v626_v57  ;;  %v654_v27 = vrot.slane %v652_v17, 5  ;;  %v662_v28 = vshrl.u32 %v320_v4, 16  ;;  %v325_v57 = vld [vmem:[%s4335_s8 + $0x90] sm:$0xf]  ;;  %v326_v16 = vld [vmem:[%s4335_s8 + $0x94] sm:$0xf] }
  0x4e   : > { %v4507_v31 = vcombine.low %v617_v11, %v627_v24  ;;  %v642_v35 = vrot.slane %v641_v19, 4  ;;  %v660_v36 = vrot.slane %v658_v22, 5  ;;  %v4509_v38 = vcombine.low %v319_v55, %v320_v4  ;;  %v327_v22 = vld [vmem:[%s4335_s8 + $0x98] sm:$0xf] }
  0x4f   : > { %3791 = vmatmul.mubr.msk.bf16.gmra.mrb[16].mxu0 %vm1134_vm1, %v4492_v61  ;;  %v632_v40 = vrot.slane %v631_v25, 4  ;;  %v664_v41 = vrot.slane %v662_v28, 4  ;;  %v655_v42 = vor.u32 %v654_v27, %v651_v12  ;;  %v668_v43 = vshll.u32 %v321_v23, 16 }
  0x50   : > { %3670 = vmatprep.mubr.msk.bf16.mxu1 %vm1134_vm1, %v4507_v31  ;;  %v647_v44 = vsel %vm4356_vm4, %v642_v35, %v646_v20  ;;  %3794 = vmatprep.mubr.msk.bf16.mxu0 %vm1134_vm1, %v4509_v38  ;;  %v678_v45 = vshll.u32 %v322_v29, 16  ;;  %v682_v48 = vshrl.u32 %v322_v29, 16  ;;  %v4519_v49 = vcombine.low %v321_v23, %v322_v29 }
  0x51   : > { %v637_v52 = vsel %vm4356_vm4, %v632_v40, %v636_v58  ;;  %v656_v53 = vrot.slane %v655_v42, 4  ;;  %v665_v54 = vor.u32 %v664_v41, %v660_v36  ;;  %v670_v55 = vrot.slane %v668_v43, 5 }
  0x52   : > { %v4526_v59 = vcombine.low %v637_v52, %v647_v44  ;;  %v680_v62 = vrot.slane %v678_v45, 5  ;;  %v684_v63 = vrot.slane %v682_v48, 4  ;;  %v672_v0 = vshrl.u32 %v321_v23, 16  ;;  %v328_v44 = vld [vmem:[%s4335_s8 + $0x9c] sm:$0xf] }
  0x53   : > { %v661_v2 = vsel %vm4356_vm4, %v656_v53, %v660_v36  ;;  %v666_v4 = vrot.slane %v665_v54, 4  ;;  %v688_v8 = vshll.u32 %v323_v50, 16  ;;  %v693_v9 = vshrl.u32 %v324_v51, 16  ;;  %v329_v52 = vld [vmem:[%s4335_s8 + $0xa0] sm:$0xf] }
  0x54   : > { %v674_v10 = vrot.slane %v672_v0, 4  ;;  %v685_v11 = vor.u32 %v684_v63, %v680_v62  ;;  %v696_v58 = vshll.u32 %v324_v51, 16  ;;  %v702_v15 = vshll.u32 %v325_v57, 16  ;;  %v330_v63 = vld [vmem:[%s4335_s8 + $0xa4] sm:$0xf] }
  0x55   : > { %3671 = vmatmul.mubr.msk.bf16.gmra.mrb[20].mxu1 %vm1134_vm1, %v4526_v59  ;;  %v671_v17 = vsel %vm4356_vm4, %v666_v4, %v670_v55  ;;  %v690_v19 = vrot.slane %v688_v8, 5  ;;  %v695_v20 = vrot.slane %v693_v9, 4  ;;  %v706_v12 = vshrl.u32 %v325_v57, 16 }
  0x56   : > { %v4536_v23 = vcombine.low %v661_v2, %v671_v17  ;;  %v675_v24 = vor.u32 %v674_v10, %v670_v55  ;;  %v686_v25 = vrot.slane %v685_v11, 4  ;;  %v698_v27 = vrot.slane %v696_v58, 5 }
  0x57   : > { %3795 = vmatmul.mubr.msk.bf16.gmra.mrb[20].mxu0 %vm1134_vm1, %v4519_v49  ;;  %v704_v28 = vrot.slane %v702_v15, 5  ;;  %v708_v29 = vrot.slane %v706_v12, 4  ;;  %v4540_v35 = vcombine.low %v324_v51, %v325_v57  ;;  %v712_v36 = vshll.u32 %v326_v16, 16 }
  0x58   : > { %3674 = vmatprep.mubr.msk.bf16.mxu1 %vm1134_vm1, %v4536_v23  ;;  %v676_v40 = vrot.slane %v675_v24, 4  ;;  %v691_v41 = vsel %vm4356_vm4, %v686_v25, %v690_v19  ;;  %v699_v42 = vor.u32 %v698_v27, %v695_v20  ;;  %v722_v43 = vshll.u32 %v327_v22, 16  ;;  %v331_v19 = vld [vmem:[%s4335_s8 + $0xa8] sm:$0xf]  ;;  %v332_v20 = vld [vmem:[%s4335_s8 + $0xac] sm:$0xf] }
  0x59   : > { %3798 = vmatprep.mubr.msk.bf16.mxu0 %vm1134_vm1, %v4540_v35  ;;  %v709_v45 = vor.u32 %v708_v29, %v704_v28  ;;  %v714_v48 = vrot.slane %v712_v36, 5  ;;  %v726_v50 = vshrl.u32 %v327_v22, 16  ;;  %v4549_v51 = vcombine.low %v326_v16, %v327_v22 }
  0x5a   : > { %v681_v53 = vsel %vm4356_vm4, %v676_v40, %v680_v62  ;;  %v700_v54 = vrot.slane %v699_v42, 4  ;;  %v724_v55 = vrot.slane %v722_v43, 5  ;;  %v716_v57 = vshrl.u32 %v326_v16, 16 }
  0x5b   : > { %v4555_v0 = vcombine.low %v681_v53, %v691_v41  ;;  %v710_v2 = vrot.slane %v709_v45, 4  ;;  %v728_v4 = vrot.slane %v726_v50, 4  ;;  %v732_v8 = vshll.u32 %v328_v44, 16  ;;  %v334_v53 = vld [vmem:[%s4335_s8 + $0xb4] sm:$0xf] }
  0x5c   : > { %v705_v9 = vsel %vm4356_vm4, %v700_v54, %v704_v28  ;;  %v718_v10 = vrot.slane %v716_v57, 4  ;;  %v737_v11 = vshrl.u32 %v329_v52, 16  ;;  %v740_v58 = vshll.u32 %v329_v52, 16 }
  0x5d   : > { %3675 = vmatmul.mubr.msk.bf16.gmra.mrb[24].mxu1 %vm1134_vm1, %v4555_v0  ;;  %v715_v62 = vsel %vm4356_vm4, %v710_v2, %v714_v48  ;;  %v729_v15 = vor.u32 %v728_v4, %v724_v55  ;;  %v734_v16 = vrot.slane %v732_v8, 5  ;;  %v746_v17 = vshll.u32 %v330_v63, 16  ;;  %v335_v4 = vld [vmem:[%s4335_s8 + $0xb8] sm:$0xf] }
  0x5e   : > { %v4565_v12 = vcombine.low %v705_v9, %v715_v62  ;;  %v719_v22 = vor.u32 %v718_v10, %v714_v48  ;;  %v739_v24 = vrot.slane %v737_v11, 4  ;;  %v742_v25 = vrot.slane %v740_v58, 5 }
  0x5f   : > { %3799 = vmatmul.mubr.msk.bf16.gmra.mrb[24].mxu0 %vm1134_vm1, %v4549_v51  ;;  %v730_v27 = vrot.slane %v729_v15, 4  ;;  %v748_v28 = vrot.slane %v746_v17, 5  ;;  %v750_v29 = vshrl.u32 %v330_v63, 16  ;;  %v4569_v36 = vcombine.low %v329_v52, %v330_v63  ;;  %v333_v52 = vld [vmem:[%s4335_s8 + $0xb0] sm:$0xf] }
  0x60   : > { %3678 = vmatprep.mubr.msk.bf16.mxu1 %vm1134_vm1, %v4565_v12  ;;  %v720_v40 = vrot.slane %v719_v22, 4  ;;  %v743_v41 = vor.u32 %v742_v25, %v739_v24  ;;  %v756_v42 = vshll.u32 %v331_v19, 16  ;;  %v766_v43 = vshll.u32 %v332_v20, 16  ;;  %v336_v24 = vld [vmem:[%s4335_s8 + $0xbc] sm:$0xf] }
  0x61   : > { %v735_v44 = vsel %vm4356_vm4, %v730_v27, %v734_v16  ;;  %v752_v45 = vrot.slane %v750_v29, 4  ;;  %3802 = vmatprep.mubr.msk.bf16.mxu0 %vm1134_vm1, %v4569_v36  ;;  %v770_v48 = vshrl.u32 %v332_v20, 16  ;;  %v4577_v50 = vcombine.low %v331_v19, %v332_v20 }
  0x62   : > { %v725_v54 = vsel %vm4356_vm4, %v720_v40, %v724_v55  ;;  %v744_v57 = vrot.slane %v743_v41, 4  ;;  %v758_v63 = vrot.slane %v756_v42, 5  ;;  %v768_v2 = vrot.slane %v766_v43, 5  ;;  %v337_v41 = vld [vmem:[%s4335_s8 + $0xc0] sm:$0xf] }
  0x63   : > { %v4584_v8 = vcombine.low %v725_v54, %v735_v44  ;;  %v753_v9 = vor.u32 %v752_v45, %v748_v28  ;;  %v772_v10 = vrot.slane %v770_v48, 4  ;;  %v760_v11 = vshrl.u32 %v331_v19, 16 }
  0x64   : > { %v749_v58 = vsel %vm4356_vm4, %v744_v57, %v748_v28  ;;  %v776_v62 = vshll.u32 %v333_v52, 16  ;;  %v781_v15 = vshrl.u32 %v334_v53, 16  ;;  %v784_v16 = vshll.u32 %v334_v53, 16 }
  0x65   : > { %3679 = vmatmul.mubr.msk.bf16.gmra.mrb[28].mxu1 %vm1134_vm1, %v4584_v8  ;;  %v754_v55 = vrot.slane %v753_v9, 4  ;;  %v762_v17 = vrot.slane %v760_v11, 4  ;;  %v773_v20 = vor.u32 %v772_v10, %v768_v2  ;;  %v790_v22 = vshll.u32 %v335_v4, 16 }
  0x66   : > { %v778_v25 = vrot.slane %v776_v62, 5  ;;  %v783_v27 = vrot.slane %v781_v15, 4  ;;  %v786_v29 = vrot.slane %v784_v16, 5  ;;  %v794_v40 = vshrl.u32 %v335_v4, 16 }
  0x67   : > { %v759_v19 = vsel %vm4356_vm4, %v754_v55, %v758_v63  ;;  %3803 = vmatmul.mubr.msk.bf16.gmra.mrb[28].mxu0 %vm1134_vm1, %v4577_v50  ;;  %v763_v28 = vor.u32 %v762_v17, %v758_v63  ;;  %v774_v42 = vrot.slane %v773_v20, 4  ;;  %v792_v43 = vrot.slane %v790_v22, 5  ;;  %v340_v20 = vld [vmem:[%s4335_s8 + $0xcc] sm:$0xf] }
  0x68   : > { %v4596_v44 = vcombine.low %v749_v58, %v759_v19  ;;  %v796_v45 = vrot.slane %v794_v40, 4  ;;  %v4598_v48 = vcombine.low %v334_v53, %v335_v4  ;;  %v787_v52 = vor.u32 %v786_v29, %v783_v27  ;;  %v338_v53 = vld [vmem:[%s4335_s8 + $0xc4] sm:$0xf]  ;;  %v339_v4 = vld [vmem:[%s4335_s8 + $0xc8] sm:$0xf] }
  0x69   : > { %v764_v54 = vrot.slane %v763_v28, 4  ;;  %v779_v57 = vsel %vm4356_vm4, %v774_v42, %v778_v25  ;;  %v800_v9 = vshll.u32 %v336_v24, 16  ;;  %v810_v10 = vshll.u32 %v337_v41, 16 }
  0x6a   : > { %3682 = vmatprep.mubr.msk.bf16.mxu1 %vm1134_vm1, %v4596_v44  ;;  %3806 = vmatprep.mubr.msk.bf16.mxu0 %vm1134_vm1, %v4598_v48  ;;  %v788_v63 = vrot.slane %v787_v52, 4  ;;  %v797_v11 = vor.u32 %v796_v45, %v792_v43  ;;  %v814_v58 = vshrl.u32 %v337_v41, 16  ;;  %v4606_v62 = vcombine.low %v336_v24, %v337_v41  ;;  %v341_v52 = vld [vmem:[%s4335_s8 + $0xd0] sm:$0xf] }
  0x6b   : > { %v769_v15 = vsel %vm4356_vm4, %v764_v54, %v768_v2  ;;  %v802_v16 = vrot.slane %v800_v9, 5  ;;  %v812_v55 = vrot.slane %v810_v10, 5  ;;  %v804_v17 = vshrl.u32 %v336_v24, 16  ;;  %v342_v54 = vld [vmem:[%s4335_s8 + $0xd4] sm:$0xf] }
  0x6c   : > { %v4613_v22 = vcombine.low %v769_v15, %v779_v57  ;;  %v793_v25 = vsel %vm4356_vm4, %v788_v63, %v792_v43  ;;  %v798_v27 = vrot.slane %v797_v11, 4  ;;  %v816_v29 = vrot.slane %v814_v58, 4 }
  0x6d   : > { %v806_v40 = vrot.slane %v804_v17, 4  ;;  %v820_v41 = vshll.u32 %v338_v53, 16  ;;  %v825_v19 = vshrl.u32 %v339_v4, 16  ;;  %v828_v28 = vshll.u32 %v339_v4, 16 }
  0x6e   : > { %3683 = vmatmul.mubr.msk.bf16.gmra.mrb[32].mxu1 %vm1134_vm1, %v4613_v22  ;;  %v803_v2 = vsel %vm4356_vm4, %v798_v27, %v802_v16  ;;  %v817_v24 = vor.u32 %v816_v29, %v812_v55  ;;  %v834_v42 = vshll.u32 %v340_v20, 16  ;;  %v838_v45 = vshrl.u32 %v340_v20, 16 }
  0x6f   : > { %v4623_v57 = vcombine.low %v793_v25, %v803_v2  ;;  %3807 = vmatmul.mubr.msk.bf16.gmra.mrb[32].mxu0 %vm1134_vm1, %v4606_v62  ;;  %v807_v43 = vor.u32 %v806_v40, %v802_v16  ;;  %v822_v9 = vrot.slane %v820_v41, 5  ;;  %v827_v10 = vrot.slane %v825_v19, 4  ;;  %v343_v19 = vld [vmem:[%s4335_s8 + $0xd8] sm:$0xf]  ;;  %v344_v2 = vld [vmem:[%s4335_s8 + $0xdc] sm:$0xf] }
  0x70   : > { %v818_v63 = vrot.slane %v817_v24, 4  ;;  %v830_v11 = vrot.slane %v828_v28, 5  ;;  %v836_v58 = vrot.slane %v834_v42, 5  ;;  %v840_v53 = vrot.slane %v838_v45, 4 }
  0x71   : > { %3686 = vmatprep.mubr.msk.bf16.mxu1 %vm1134_vm1, %v4623_v57  ;;  %v808_v15 = vrot.slane %v807_v43, 4  ;;  %v4629_v17 = vcombine.low %v339_v4, %v340_v20  ;;  %v844_v25 = vshll.u32 %v341_v52, 16  ;;  %v854_v27 = vshll.u32 %v342_v54, 16  ;;  %v345_v20 = vld [vmem:[%s4335_s8 + $0xe0] sm:$0xf] }
  0x72   : > { %v823_v16 = vsel %vm4356_vm4, %v818_v63, %v822_v9  ;;  %v831_v29 = vor.u32 %v830_v11, %v827_v10  ;;  %v841_v40 = vor.u32 %v840_v53, %v836_v58  ;;  %v858_v41 = vshrl.u32 %v342_v54, 16 }
  0x73   : > { %v813_v28 = vsel %vm4356_vm4, %v808_v15, %v812_v55  ;;  %3810 = vmatprep.mubr.msk.bf16.mxu0 %vm1134_vm1, %v4629_v17  ;;  %v846_v24 = vrot.slane %v844_v25, 5  ;;  %v856_v42 = vrot.slane %v854_v27, 5  ;;  %v4639_v4 = vcombine.low %v341_v52, %v342_v54  ;;  %v346_v27 = vld [vmem:[%s4335_s8 + $0xe4] sm:$0xf] }
  0x74   : > { %v4642_v45 = vcombine.low %v813_v28, %v823_v16  ;;  %v832_v43 = vrot.slane %v831_v29, 4  ;;  %v842_v9 = vrot.slane %v841_v40, 4  ;;  %v860_v10 = vrot.slane %v858_v41, 4  ;;  %v347_v16 = vld [vmem:[%s4335_s8 + $0xe8] sm:$0xf] }
  0x75   : > { %5106 = vst [vmem:[#allocation5_spill] sm:$0xff] %v4639_v4  ;;  %v848_v63 = vshrl.u32 %v341_v52, 16  ;;  %v864_v11 = vshll.u32 %v343_v19, 16  ;;  %v869_v53 = vshrl.u32 %v344_v2, 16  ;;  %v872_v7 = vshll.u32 %v344_v2, 16 }
  0x76   : > { %5107 = vst [vmem:[#allocation6_spill] sm:$0xff] %v4642_v45  ;;  %3687 = vmatmul.mubr.msk.bf16.gmra.mrb[36].mxu1 %vm1134_vm1, %v4642_v45  ;;  %v837_v55 = vsel %vm4356_vm4, %v832_v43, %v836_v58  ;;  %v847_v54 = vsel %vm4356_vm4, %v842_v9, %v846_v24  ;;  %v861_v15 = vor.u32 %v860_v10, %v856_v42  ;;  %v878_v25 = vshll.u32 %v345_v20, 16 }
  0x77   : > { %v4652_v29 = vcombine.low %v837_v55, %v847_v54  ;;  %3811 = vmatmul.mubr.msk.bf16.gmra.mrb[36].mxu0 %vm1134_vm1, %v4639_v4  ;;  %v850_v52 = vrot.slane %v848_v63, 4  ;;  %v866_v40 = vrot.slane %v864_v11, 5  ;;  %v871_v41 = vrot.slane %v869_v53, 4  ;;  %v348_v53 = vld [vmem:[%s4335_s8 + $0xec] sm:$0xf] }
  0x78   : > { %v862_v19 = vrot.slane %v861_v15, 4  ;;  %v874_v28 = vrot.slane %v872_v7, 5  ;;  %v880_v58 = vrot.slane %v878_v25, 5  ;;  %v882_v43 = vshrl.u32 %v345_v20, 16  ;;  %v349_v15 = vld [vmem:[%s4335_s8 + $0xf0] sm:$0xf] }
  0x79   : > { %5108 = vst [vmem:[#allocation7_spill] sm:$0xff] %v4652_v29  ;;  %3690 = vmatprep.mubr.msk.bf16.mxu1 %vm1134_vm1, %v4652_v29  ;;  %v851_v9 = vor.u32 %v850_v52, %v846_v24  ;;  %v4658_v10 = vcombine.low %v344_v2, %v345_v20  ;;  %v888_v55 = vshll.u32 %v346_v27, 16  ;;  %v898_v54 = vshll.u32 %v347_v16, 16 }
  0x7a   : > { %v867_v6 = vsel %vm4356_vm4, %v862_v19, %v866_v40  ;;  %v884_v63 = vrot.slane %v882_v43, 4  ;;  %v875_v11 = vor.u32 %v874_v28, %v871_v41  ;;  %v902_v1 = vshrl.u32 %v347_v16, 16  ;;  %v350_v19 = vld [vmem:[%s4335_s8 + $0xf4] sm:$0xf] }
  0x7b   : > { %5109 = vst [vmem:[#allocation8_spill] sm:$0xff] %v4658_v10  ;;  %v852_v7 = vrot.slane %v851_v9, 4  ;;  %3814 = vmatprep.mubr.msk.bf16.mxu0 %vm1134_vm1, %v4658_v10  ;;  %v890_v25 = vrot.slane %v888_v55, 5  ;;  %v900_v4 = vrot.slane %v898_v54, 5  ;;  %v4666_v24 = vcombine.low %v346_v27, %v347_v16 }
  0x7c   : > { %v876_v2 = vrot.slane %v875_v11, 4  ;;  %v885_v20 = vor.u32 %v884_v63, %v880_v58  ;;  %v904_v52 = vrot.slane %v902_v1, 4  ;;  %v892_v29 = vshrl.u32 %v346_v27, 16 }
  0x7d   : > { %5110 = vst [vmem:[#allocation9_spill] sm:$0xff] %v4666_v24  ;;  %v857_v40 = vsel %vm4356_vm4, %v852_v7, %v856_v42  ;;  %v908_v41 = vshll.u32 %v348_v53, 16  ;;  %v913_v28 = vshrl.u32 %v349_v15, 16  ;;  %v916_v43 = vshll.u32 %v349_v15, 16  ;;  %v351_v42 = vld [vmem:[%s4335_s8 + $0xf8] sm:$0xf] }
  0x7e   : > { %v4671_v9 = vcombine.low %v857_v40, %v867_v6  ;;  %v881_v55 = vsel %vm4356_vm4, %v876_v2, %v880_v58  ;;  %v886_v16 = vrot.slane %v885_v20, 4  ;;  %v894_v54 = vrot.slane %v892_v29, 4  ;;  %v352_v2 = vld [vmem:[%s4335_s8 + $0xfc] sm:$0xf] }
  0x7f   : > { %3815 = vmatmul.mubr.msk.bf16.gmra.mrb[40].mxu0 %vm1134_vm1, %v4666_v24  ;;  %v905_v1 = vor.u32 %v904_v52, %v900_v4  ;;  %v910_v27 = vrot.slane %v908_v41, 5  ;;  %v915_v63 = vrot.slane %v913_v28, 4  ;;  %v918_v11 = vrot.slane %v916_v43, 5 }
  0x80   : > { %5111 = vst [vmem:[#allocation10_spill] sm:$0xff] %v4671_v9  ;;  %3691 = vmatmul.mubr.msk.bf16.gmra.mrb[40].mxu1 %vm1134_vm1, %v4671_v9  ;;  %v891_v6 = vsel %vm4356_vm4, %v886_v16, %v890_v25  ;;  %v895_v53 = vor.u32 %v894_v54, %v890_v25  ;;  %v922_v7 = vshll.u32 %v350_v19, 16  ;;  %v926_v58 = vshrl.u32 %v350_v19, 16  ;;  %v353_v9 = vld [vmem:[%s4335_s8 + $0x100] sm:$0xf] }
  0x81   : > { %v4683_v29 = vcombine.low %v881_v55, %v891_v6  ;;  %v906_v20 = vrot.slane %v905_v1, 4  ;;  %v4685_v52 = vcombine.low %v349_v15, %v350_v19  ;;  %v919_v40 = vor.u32 %v918_v11, %v915_v63  ;;  %v354_v19 = vld [vmem:[%s4335_s8 + $0x104] sm:$0xf]  ;;  %v355_v6 = vld [vmem:[%s4335_s8 + $0x108] sm:$0xf] }
  0x82   : > { %v896_v41 = vrot.slane %v895_v53, 4  ;;  %v924_v28 = vrot.slane %v922_v7, 5  ;;  %v928_v43 = vrot.slane %v926_v58, 4  ;;  %v932_v24 = vshll.u32 %v351_v42, 16 }
  0x83   : > { %5112 = vst [vmem:[#allocation11_spill] sm:$0xff] %v4683_v29  ;;  %5113 = vst [vmem:[#allocation12_spill] sm:$0xff] %v4685_v52  ;;  %3694 = vmatprep.mubr.msk.bf16.mxu1 %vm1134_vm1, %v4683_v29  ;;  %v911_v25 = vsel %vm4356_vm4, %v906_v20, %v910_v27  ;;  %3818 = vmatprep.mubr.msk.bf16.mxu0 %vm1134_vm1, %v4685_v52  ;;  %v920_v55 = vrot.slane %v919_v40, 4  ;;  %v942_v16 = vshll.u32 %v352_v2, 16  ;;  %v946_v15 = vshrl.u32 %v352_v2, 16 }
  0x84   : > { %v901_v54 = vsel %vm4356_vm4, %v896_v41, %v900_v4  ;;  %v929_v1 = vor.u32 %v928_v43, %v924_v28  ;;  %v934_v63 = vrot.slane %v932_v24, 5  ;;  %v4697_v11 = vcombine.low %v351_v42, %v352_v2  ;;  %v356_v43 = vld [vmem:[%s4335_s8 + $0x10c] sm:$0xf] }
  0x85   : > { %v4700_v53 = vcombine.low %v901_v54, %v911_v25  ;;  %v925_v27 = vsel %vm4356_vm4, %v920_v55, %v924_v28  ;;  %v944_v7 = vrot.slane %v942_v16, 5  ;;  %v948_v58 = vrot.slane %v946_v15, 4 }
  0x86   : > { %5114 = vst [vmem:[#allocation13_spill] sm:$0xff] %v4697_v11  ;;  %v930_v20 = vrot.slane %v929_v1, 4  ;;  %v936_v40 = vshrl.u32 %v351_v42, 16  ;;  %v952_v52 = vshll.u32 %v353_v9, 16  ;;  %v957_v29 = vshrl.u32 %v354_v19, 16 }
  0x87   : > { %3819 = vmatmul.mubr.msk.bf16.gmra.mrb[44].mxu0 %vm1134_vm1, %v4697_v11  ;;  %v949_v4 = vor.u32 %v948_v58, %v944_v7  ;;  %v960_v24 = vshll.u32 %v354_v19, 16  ;;  %v966_v2 = vshll.u32 %v355_v6, 16  ;;  %v970_v41 = vshrl.u32 %v355_v6, 16  ;;  %v357_v9 = vld [vmem:[%s4335_s8 + $0x110] sm:$0xf] }
  0x88   : > { %3695 = vmatmul.mubr.msk.bf16.gmra.mrb[44].mxu1 %vm1134_vm1, %v4700_v53  ;;  %v935_v28 = vsel %vm4356_vm4, %v930_v20, %v934_v63  ;;  %v938_v25 = vrot.slane %v936_v40, 4  ;;  %v954_v55 = vrot.slane %v952_v52, 5  ;;  %v959_v42 = vrot.slane %v957_v29, 4 }
  0x89   : > { %v4712_v16 = vcombine.low %v925_v27, %v935_v28  ;;  %v950_v15 = vrot.slane %v949_v4, 4  ;;  %v962_v54 = vrot.slane %v960_v24, 5  ;;  %v968_v1 = vrot.slane %v966_v2, 5  ;;  %v358_v27 = vld [vmem:[%s4335_s8 + $0x114] sm:$0xf] }
  0x8a   : > { %v939_v58 = vor.u32 %v938_v25, %v934_v63  ;;  %v972_v11 = vrot.slane %v970_v41, 4  ;;  %v4714_v10 = vcombine.low %v354_v19, %v355_v6  ;;  %v976_v45 = vshll.u32 %v356_v43, 16  ;;  %v359_v28 = vld [vmem:[%s4335_s8 + $0x118] sm:$0xf] }
  0x8b   : > { %5115 = vst [vmem:[#allocation14_spill] sm:$0xff] %v4712_v16  ;;  %3698 = vmatprep.mubr.msk.bf16.mxu1 %vm1134_vm1, %v4712_v16  ;;  %v955_v52 = vsel %vm4356_vm4, %v950_v15, %v954_v55  ;;  %v963_v20 = vor.u32 %v962_v54, %v959_v42  ;;  %v986_v29 = vshll.u32 %v357_v9, 16  ;;  %v990_v40 = vshrl.u32 %v357_v9, 16  ;;  %v360_v54 = vld [vmem:[%s4335_s8 + $0x11c] sm:$0xf] }
  0x8c   : > { %v940_v4 = vrot.slane %v939_v58, 4  ;;  %3822 = vmatprep.mubr.msk.bf16.mxu0 %vm1134_vm1, %v4714_v10  ;;  %v973_v63 = vor.u32 %v972_v11, %v968_v1  ;;  %v978_v19 = vrot.slane %v976_v45, 5  ;;  %v4724_v6 = vcombine.low %v356_v43, %v357_v9 }
  0x8d   : > { %v964_v24 = vrot.slane %v963_v20, 4  ;;  %v988_v2 = vrot.slane %v986_v29, 5  ;;  %v992_v41 = vrot.slane %v990_v40, 4  ;;  %v980_v25 = vshrl.u32 %v356_v43, 16  ;;  %v361_v43 = vld [vmem:[%s4335_s8 + $0x120] sm:$0xf] }
  0x8e   : > { %5116 = vst [vmem:[#allocation15_spill] sm:$0xff] %v4724_v6  ;;  %v945_v55 = vsel %vm4356_vm4, %v940_v4, %v944_v7  ;;  %v974_v42 = vrot.slane %v973_v63, 4  ;;  %v996_v15 = vshll.u32 %v358_v27, 16  ;;  %v1001_v58 = vshrl.u32 %v359_v28, 16  ;;  %v362_v27 = vld [vmem:[%s4335_s8 + $0x124] sm:$0xf] }
  0x8f   : > { %v4729_v16 = vcombine.low %v945_v55, %v955_v52  ;;  %v969_v45 = vsel %vm4356_vm4, %v964_v24, %v968_v1  ;;  %3823 = vmatmul.mubr.msk.bf16.gmra.mrb[48].mxu0 %vm1134_vm1, %v4724_v6  ;;  %v982_v11 = vrot.slane %v980_v25, 4  ;;  %v993_v9 = vor.u32 %v992_v41, %v988_v2 }
  0x90   : > { %v979_v20 = vsel %vm4356_vm4, %v974_v42, %v978_v19  ;;  %v998_v7 = vrot.slane %v996_v15, 5  ;;  %v1003_v29 = vrot.slane %v1001_v58, 4  ;;  %v1004_v40 = vshll.u32 %v359_v28, 16  ;;  %v363_v42 = vld [vmem:[%s4335_s8 + $0x128] sm:$0xf] }
  0x91   : > { %5117 = vst [vmem:[#allocation16_spill] sm:$0xff] %v4729_v16  ;;  %3699 = vmatmul.mubr.msk.bf16.gmra.mrb[48].mxu1 %vm1134_vm1, %v4729_v16  ;;  %v4741_v52 = vcombine.low %v969_v45, %v979_v20  ;;  %v983_v1 = vor.u32 %v982_v11, %v978_v19  ;;  %v994_v4 = vrot.slane %v993_v9, 4  ;;  %v1010_v63 = vshll.u32 %v360_v54, 16  ;;  %v364_v20 = vld [vmem:[%s4335_s8 + $0x12c] sm:$0xf] }
  0x92   : > { %v1006_v24 = vrot.slane %v1004_v40, 5  ;;  %v1014_v41 = vshrl.u32 %v360_v54, 16  ;;  %v4743_v25 = vcombine.low %v359_v28, %v360_v54  ;;  %v1020_v55 = vshll.u32 %v361_v43, 16  ;;  %v365_v54 = vld [vmem:[%s4335_s8 + $0x130] sm:$0xf] }
  0x93   : > { %5118 = vst [vmem:[#allocation17_spill] sm:$0xff] %v4741_v52  ;;  %3702 = vmatprep.mubr.msk.bf16.mxu1 %vm1134_vm1, %v4741_v52  ;;  %v984_v15 = vrot.slane %v983_v1, 4  ;;  %v999_v58 = vsel %vm4356_vm4, %v994_v4, %v998_v7  ;;  %v1012_v6 = vrot.slane %v1010_v63, 5  ;;  %v1030_v45 = vshll.u32 %v362_v27, 16 }
  0x94   : > { %5119 = vst [vmem:[#allocation18_spill] sm:$0xff] %v4743_v25  ;;  %v1016_v19 = vrot.slane %v1014_v41, 4  ;;  %3826 = vmatprep.mubr.msk.bf16.mxu0 %vm1134_vm1, %v4743_v25  ;;  %v1007_v11 = vor.u32 %v1006_v24, %v1003_v29  ;;  %v1022_v9 = vrot.slane %v1020_v55, 5  ;;  %v1034_v28 = vshrl.u32 %v362_v27, 16 }
  0x95   : > { %v989_v40 = vsel %vm4356_vm4, %v984_v15, %v988_v2  ;;  %v1032_v16 = vrot.slane %v1030_v45, 5  ;;  %v4756_v1 = vcombine.low %v361_v43, %v362_v27  ;;  %v1024_v7 = vshrl.u32 %v361_v43, 16  ;;  %v366_v43 = vld [vmem:[%s4335_s8 + $0x134] sm:$0xf] }
  0x96   : > { %v4758_v4 = vcombine.low %v989_v40, %v999_v58  ;;  %v1008_v63 = vrot.slane %v1007_v11, 4  ;;  %v1017_v41 = vor.u32 %v1016_v19, %v1012_v6  ;;  %v1036_v52 = vrot.slane %v1034_v28, 4  ;;  %v367_v58 = vld [vmem:[%s4335_s8 + $0x138] sm:$0xf] }
  0x97   : > { %5120 = vst [vmem:[#allocation19_spill] sm:$0xff] %v4756_v1  ;;  %3827 = vmatmul.mubr.msk.bf16.gmra.mrb[52].mxu0 %vm1134_vm1, %v4756_v1  ;;  %v1026_v29 = vrot.slane %v1024_v7, 4  ;;  %v1040_v24 = vshll.u32 %v363_v42, 16  ;;  %v4762_v55 = vcombine.low %v364_v20, %v365_v54  ;;  %v2371_v25 = vshrl.u32 %v364_v20, 16 }
  0x98   : > { %5121 = vst [vmem:[#allocation20_spill] sm:$0xff] %v4758_v4  ;;  %v1013_v2 = vsel %vm4356_vm4, %v1008_v63, %v1012_v6  ;;  %v1018_v27 = vrot.slane %v1017_v41, 4  ;;  %v1037_v15 = vor.u32 %v1036_v52, %v1032_v16  ;;  %v2374_v45 = vshll.u32 %v364_v20, 16 }
  0x99   : > { %5122 = vst [vmem:[#allocation21_spill] sm:$0xff] %v4762_v55  ;;  %3703 = vmatmul.mubr.msk.bf16.gmra.mrb[52].mxu1 %vm1134_vm1, %v4758_v4  ;;  %v1027_v19 = vor.u32 %v1026_v29, %v1022_v9  ;;  %v1042_v11 = vrot.slane %v1040_v24, 5  ;;  %3830 = vmatprep.mubr.msk.bf16.mxu0 %vm1134_vm1, %v4762_v55  ;;  %v2373_v42 = vrot.slane %v2371_v25, 4  ;;  %v2380_v28 = vshll.u32 %v365_v54, 16 }
  0x9a   : > { %v1023_v40 = vsel %vm4356_vm4, %v1018_v27, %v1022_v9  ;;  %v1038_v6 = vrot.slane %v1037_v15, 4  ;;  %v2376_v7 = vrot.slane %v2374_v45, 5  ;;  %v2384_v52 = vshrl.u32 %v365_v54, 16 }
  0x9b   : > { %v4774_v20 = vcombine.low %v1013_v2, %v1023_v40  ;;  %v1028_v63 = vrot.slane %v1027_v19, 4  ;;  %v2382_v41 = vrot.slane %v2380_v28, 5  ;;  %v4776_v1 = vcombine.low %v366_v43, %v367_v58 }
  0x9c   : > { %v1043_v29 = vsel %vm4356_vm4, %v1038_v6, %v1042_v11  ;;  %v2386_v24 = vrot.slane %v2384_v52, 4  ;;  %v2390_v4 = vshll.u32 %v366_v43, 16  ;;  %v2394_v55 = vshrl.u32 %v366_v43, 16 }
  0x9d   : > { %3706 = vmatprep.mubr.msk.bf16.mxu1 %vm1134_vm1, %v4774_v20  ;;  %v1033_v25 = vsel %vm4356_vm4, %v1028_v63, %v1032_v16  ;;  %v2400_v9 = vshll.u32 %v367_v58, 16  ;;  %v2404_v54 = vshrl.u32 %v367_v58, 16  ;;  %v2377_v19 = vor.u32 %v2376_v7, %v2373_v42  ;;  %v4794_v16 = vld [vmem:[%s4335_s8 + $0x13c] sm:$0xf]  ;;  %s4988_s8 = scalar_lea.vmem %s5079_s3, %s3300_s5 }
  0x9e   : > { %v4785_v2 = vcombine.low %v1033_v25, %v1043_v29  ;;  %v2392_v27 = vrot.slane %v2390_v4, 5  ;;  %v2396_v15 = vrot.slane %v2394_v55, 4  ;;  %v2387_v11 = vor.u32 %v2386_v24, %v2382_v41 }
  0x9f   : > { %3831 = vmatmul.mubr.msk.bf16.gmra.mrb[56].mxu0 %vm1134_vm1, %v4776_v1  ;;  %v2402_v45 = vrot.slane %v2400_v9, 5  ;;  %v2406_v43 = vrot.slane %v2404_v54, 4  ;;  %v2378_v55 = vrot.slane %v2377_v19, 4  ;;  %v2410_v40 = vshll.u32 %v4794_v16, 16  ;;  %v4203_v54 = vld [vmem:[%s5078_s2 + $0x4] sm:$0x3] }
  0xa0   : > { %3836 = vmatprep.mubr.msk.bf16.mxu0 %vm1134_vm1, %v4387_v26  ;;  %v2397_v58 = vor.u32 %v2396_v15, %v2392_v27  ;;  %v2388_v28 = vrot.slane %v2387_v11, 4  ;;  %v4200_v15 = vld [vmem:[%s4812_s22 + $0x8] sm:$0xff]  }
  0xa1   : > { %3707 = vmatmul.mubr.msk.bf16.gmra.mrb[56].mxu1 %vm1134_vm1, %v4785_v2  ;;  %v2407_v4 = vor.u32 %v2406_v43, %v2402_v45  ;;  %v2383_v26 = vsel %vm4356_vm4, %v2378_v55, %v2382_v41  ;;  %v2412_v7 = vrot.slane %v2410_v40, 5  ;;  %v4204_v43 = vld [vmem:[%s5078_s2 + $0x6] sm:$0x3]  ;;  %v3090_v40 = vshrl.u32 %v4200_v15, 16 }
  0xa2   : > { %3720 = vmatprep.mubr.msk.bf16.mxu1 %vm1134_vm1, %v4397_v39  ;;  %v2398_v6 = vrot.slane %v2397_v58, 4  ;;  %v2393_v42 = vsel %vm4356_vm4, %v2388_v28, %v2392_v27  ;;  %v5142_v28 = vld [vmem:[#allocation4_spill] sm:$0xff] }
  0xa3   : > { %v2408_v52 = vrot.slane %v2407_v4, 4  ;;  %v4805_v63 = vcombine.low %v2383_v26, %v2393_v42 }
  0xa4   : > { %v2403_v39 = vsel %vm4356_vm4, %v2398_v6, %v2402_v45  ;;  %v5141_v45 = vld [vmem:[#allocation3_spill] sm:$0xff] }
  0xa5   : > { %v2413_v29 = vsel %vm4356_vm4, %v2408_v52, %v2412_v7 }
  0xa6   : > { %v4818_v41 = vcombine.low %v2403_v39, %v2413_v29 }
  0xa7   : > { %3837 = vmatmul.mubr.msk.bf16.vlgmr.msra.gmra.mrb[0].mxu0 %vm1134_vm1, %v4393_v32  ;;  %v5124_v32 = vld [vmem:[#allocation7_spill] sm:$0xff] }
  0xa8   : > { %3840 = vmatprep.mubr.msk.bf16.mxu0 %vm1134_vm1, %v4422_v18  ;;  %v5127_v18 = vld [vmem:[#allocation10_spill] sm:$0xff] }
  0xa9   : > { %3721 = vmatmul.mubr.msk.bf16.vlgmr.msra.gmra.mrb[8].mxu1 %vm1134_vm1, %v4403_v46  ;;  %v5125_v46 = vld [vmem:[#allocation5_spill] sm:$0xff] }
  0xaa   : > { %3897 = vmatpush3.bf16.msra.mxu1 %v4317_v3  ;;  %3724 = vmatprep.mubr.msk.bf16.mxu1 %vm1134_vm1, %v4416_v13  ;;  %v5123_v3 = vld [vmem:[#allocation6_spill] sm:$0xff]  ;;  %v5126_v13 = vld [vmem:[#allocation8_spill] sm:$0xff] }
  0xab   : > { %4120 = vmatprep.subr.msk.bf16.mxu1 %vm1225_vm0, %v4202_v37 }
  0xaf   : > { %3841 = vmatmul.mubr.msk.bf16.gmra.mrb[4].mxu0 %vm1134_vm1, %v4435_v30  ;;  %v5128_v30 = vld [vmem:[#allocation11_spill] sm:$0xff] }
  0xb0   : > { %3844 = vmatprep.mubr.msk.bf16.mxu0 %vm1134_vm1, %v4449_v56  ;;  %v5130_v56 = vld [vmem:[#allocation12_spill] sm:$0xff] }
  0xb1   : > { %3725 = vmatmul.mubr.msk.bf16.gmra.mrb[12].mxu1 %vm1134_vm1, %v4439_v34  ;;  %v5129_v34 = vld [vmem:[#allocation9_spill] sm:$0xff] }
  0xb2   : > { %3728 = vmatprep.mubr.msk.bf16.mxu1 %vm1134_vm1, %v4451_v60  ;;  %v5131_v60 = vld [vmem:[#allocation14_spill] sm:$0xff] }
  0xb7   : > { %3845 = vmatmul.mubr.msk.bf16.gmra.mrb[8].mxu0 %vm1134_vm1, %v4468_v21  ;;  %v5133_v21 = vld [vmem:[#allocation21_spill] sm:$0xff] }
  0xb8   : > { %3848 = vmatprep.mubr.msk.bf16.mxu0 %vm1134_vm1, %v4476_v33  ;;  %v2888_v33 = vshll.u32 %v5133_v21, 16 }
  0xb9   : > { %3729 = vmatmul.mubr.msk.bf16.gmra.mrb[16].mxu1 %vm1134_vm1, %v4463_v14  ;;  %v5132_v14 = vld [vmem:[#allocation13_spill] sm:$0xff] }
  0xba   : > { %3732 = vmatprep.mubr.msk.bf16.mxu1 %vm1134_vm1, %v4482_v47  ;;  %v5134_v47 = vld [vmem:[#allocation16_spill] sm:$0xff] }
  0xbf   : > { %3849 = vmatmul.mubr.msk.bf16.gmra.mrb[12].mxu0 %vm1134_vm1, %v4497_v5  ;;  %v2890_v5 = vrot.slane %v2888_v33, 1 }
  0xc0   : > { %3852 = vmatprep.mubr.msk.bf16.mxu0 %vm1134_vm1, %v4507_v31  ;;  %v2892_v31 = vshll.u32 %v4776_v1, 16 }
  0xc1   : > { %3733 = vmatmul.mubr.msk.bf16.gmra.mrb[20].mxu1 %vm1134_vm1, %v4492_v61  ;;  %v2886_v61 = vshrl.u32 %v5133_v21, 16 }
  0xc2   : > { %3736 = vmatprep.mubr.msk.bf16.mxu1 %vm1134_vm1, %v4509_v38 }
  0xc7   : > { %3853 = vmatmul.mubr.msk.bf16.gmra.mrb[16].mxu0 %vm1134_vm1, %v4526_v59  ;;  %v5136_v59 = vld [vmem:[#allocation15_spill] sm:$0xff] }
  0xc8   : > { %3856 = vmatprep.mubr.msk.bf16.mxu0 %vm1134_vm1, %v4536_v23 }
  0xc9   : > { %3737 = vmatmul.mubr.msk.bf16.gmra.mrb[24].mxu1 %vm1134_vm1, %v4519_v49  ;;  %v5135_v49 = vld [vmem:[#allocation17_spill] sm:$0xff] }
  0xca   : > { %3740 = vmatprep.mubr.msk.bf16.mxu1 %vm1134_vm1, %v4540_v35 }
  0xcf   : > { %3857 = vmatmul.mubr.msk.bf16.gmra.mrb[20].mxu0 %vm1134_vm1, %v4555_v0  ;;  %v3488_v0 = vcombine.low %v4794_v16, %v4794_v16  ;;  %v3086_v16 = vshll.u32 %v4200_v15, 16 }
  0xd0   : > { %3860 = vmatprep.mubr.msk.bf16.mxu0 %vm1134_vm1, %v4565_v12 }
  0xd1   : > { %3741 = vmatmul.mubr.msk.bf16.gmra.mrb[28].mxu1 %vm1134_vm1, %v4549_v51  ;;  %v5137_v51 = vld [vmem:[#allocation18_spill] sm:$0xff]  ;;  %v3088_v4 = vrot.slane %v3086_v16, 1 }
  0xd2   : > { %3744 = vmatprep.mubr.msk.bf16.mxu1 %vm1134_vm1, %v4569_v36  ;;  %v2891_v36 = vor.u32 %v2890_v5, %v2886_v61 }
  0xd3   : > { %v3092_v52 = vor.u32 %v3090_v40, %v3088_v4 }
  0xd7   : > { %3861 = vmatmul.mubr.msk.bf16.gmra.mrb[24].mxu0 %vm1134_vm1, %v4584_v8  ;;  %v2896_v8 = vshrl.u32 %v4776_v1, 16 }
  0xd8   : > { %3864 = vmatprep.mubr.msk.bf16.mxu0 %vm1134_vm1, %v4596_v44  ;;  %v2900_v44 = vshll.u32 %v3488_v0, 16 }
  0xd9   : > { %3745 = vmatmul.mubr.msk.bf16.gmra.mrb[32].mxu1 %vm1134_vm1, %v4577_v50  ;;  %v2894_v50 = vrot.slane %v2892_v31, 1 }
  0xda   : > { %3748 = vmatprep.mubr.msk.bf16.mxu1 %vm1134_vm1, %v4598_v48  ;;  %v5138_v48 = vld [vmem:[#allocation20_spill] sm:$0xff]  ;;  %v2902_v24 = vrot.slane %v2900_v44, 1 }
  0xdf   : > { %3865 = vmatmul.mubr.msk.bf16.gmra.mrb[28].mxu0 %vm1134_vm1, %v4613_v22 }
  0xe0   : > { %3868 = vmatprep.mubr.msk.bf16.mxu0 %vm1134_vm1, %v4623_v57  ;;  %v5139_v57 = vld [vmem:[#allocation19_spill] sm:$0xff] }
  0xe1   : > { %3749 = vmatmul.mubr.msk.bf16.gmra.mrb[36].mxu1 %vm1134_vm1, %v4606_v62  ;;  %v2895_v62 = vsel %vm2885_vm5, %v2891_v36, %v2894_v50 }
  0xe2   : > { %3752 = vmatprep.mubr.msk.bf16.mxu1 %vm1134_vm1, %v4629_v17 }
  0xe7   : > { %3869 = vmatmul.mubr.msk.bf16.gmra.mrb[32].mxu0 %vm1134_vm1, %v5123_v3 }
  0xe8   : > { %3872 = vmatprep.mubr.msk.bf16.mxu0 %vm1134_vm1, %v5124_v32 }
  0xe9   : > { %3753 = vmatmul.mubr.msk.bf16.gmra.mrb[40].mxu1 %vm1134_vm1, %v5125_v46 }
  0xea   : > { %3756 = vmatprep.mubr.msk.bf16.mxu1 %vm1134_vm1, %v5126_v13 }
  0xef   : > { %3873 = vmatmul.mubr.msk.bf16.gmra.mrb[36].mxu0 %vm1134_vm1, %v5127_v18 }
  0xf0   : > { %3876 = vmatprep.mubr.msk.bf16.mxu0 %vm1134_vm1, %v5128_v30 }
  0xf1   : > { %3757 = vmatmul.mubr.msk.bf16.gmra.mrb[44].mxu1 %vm1134_vm1, %v5129_v34 }
  0xf2   : > { %3760 = vmatprep.mubr.msk.bf16.mxu1 %vm1134_vm1, %v5130_v56 }
  0xf7   : > { %3877 = vmatmul.mubr.msk.bf16.gmra.mrb[40].mxu0 %vm1134_vm1, %v4700_v53  ;;  %v2898_v53 = vor.u32 %v2896_v8, %v2894_v50 }
  0xf8   : > { %3880 = vmatprep.mubr.msk.bf16.mxu0 %vm1134_vm1, %v5131_v60 }
  0xf9   : > { %3761 = vmatmul.mubr.msk.bf16.gmra.mrb[48].mxu1 %vm1134_vm1, %v5132_v14  ;;  %v2903_v9 = vsel %vm2885_vm5, %v2898_v53, %v2902_v24 }
  0xfa   : > { %3764 = vmatprep.mubr.msk.bf16.mxu1 %vm1134_vm1, %v4714_v10 }
  0xff   : > { %3881 = vmatmul.mubr.msk.bf16.gmra.mrb[44].mxu0 %vm1134_vm1, %v5134_v47 }
 0x100   : > { %v4916_v38 = vpop.f32.mrb[0].mxu1  ;;  %3884 = vmatprep.mubr.msk.bf16.mxu0 %vm1134_vm1, %v5135_v49 }
 0x101   : > { %3765 = vmatmul.mubr.msk.bf16.gmra.mrb[52].mxu1 %vm1134_vm1, %v5136_v59  ;;  %v4922_v23 = vpop.f32.mrb[1].mxu1 }
 0x102   : > { %v4924_v35 = vpop.f32.mrb[2].mxu1  ;;  %3768 = vmatprep.mubr.msk.bf16.mxu1 %vm1134_vm1, %v5137_v51 }
 0x103   : > { %v4930_v12 = vpop.f32.mrb[3].mxu1 }
 0x107   : > { %3885 = vmatmul.mubr.msk.bf16.gmra.mrb[48].mxu0 %vm1134_vm1, %v5138_v48 }
 0x108   : > { %v4936_v22 = vpop.f32.mrb[4].mxu1  ;;  %3888 = vmatprep.mubr.msk.bf16.mxu0 %vm1134_vm1, %v4774_v20  ;;  %v5140_v20 = vld [vmem:[#allocation2_spill] sm:$0xff] }
 0x109   : > { %3769 = vmatmul.mubr.msk.bf16.gmra.mrb[56].mxu1 %vm1134_vm1, %v5139_v57  ;;  %v4942_v17 = vpop.f32.mrb[5].mxu1 }
 0x10a   : > { %v4944_v10 = vpop.f32.mrb[6].mxu1  ;;  %3898 = vmatprep.mubr.msk.bf16.mxu1 %vm1134_vm1, %v2895_v62 }
 0x10b   : > { %v4947_v25 = vpop.f32.mrb[7].mxu1 }
 0x10f   : > { %3889 = vmatmul.mubr.msk.bf16.gmra.mrb[52].mxu0 %vm1134_vm1, %v4785_v2  ;;  %v4199_v2 = vld [vmem:[%s4812_s22] sm:$0xff]  }
 0x110   : > { %3892 = vmatprep.mubr.msk.bf16.mxu0 %vm1134_vm1, %v4805_v63  ;;  %v3082_v27 = vshll.u32 %v4199_v2, 16  ;;  %v3080_v19 = vshrl.u32 %v4199_v2, 16 }
 0x111   : > { %3899 = vmatmul.mubr.msk.bf16.vlgmr.msra.gmra.mrb[60].mxu1 %vm1134_vm1, %v2903_v9 }
 0x112   : > { %3903 = vmatpush3.bf16.msra.mxu1 %v5140_v20  ;;  %3904 = vmatprep.mubr.msk.bf16.mxu1 %vm1134_vm1, %v5133_v21  ;;  %v3084_v11 = vrot.slane %v3082_v27, 1 }
 0x113   : > { %4121 = vmatprep.subr.msk.bf16.mxu1 %vm1225_vm0, %v4203_v54 }
 0x114   : > { %v3085_v58 = vor.u32 %v3084_v11, %v3080_v19 }
 0x116   : > { %v3089_v55 = vsel %vm2885_vm5, %v3085_v58, %v3088_v4 }
 0x117   : > { %3893 = vmatmul.mubr.msk.bf16.gmra.mrb[56].mxu0 %vm1134_vm1, %v4818_v41 }
 0x11d   : > { %3905 = vmatmul.mubr.msk.bf16.vlgmr.msra.gmra.mrb[60].mxu1 %vm1134_vm1, %v4776_v1  ;;  %v4201_v1 = vld [vmem:[%s4812_s22 + $0x10] ss:$0 sps:$4 sm:$0xff]  }
 0x11e   : > { %3909 = vmatpush3.bf16.msra.mxu1 %v5141_v45  ;;  %3910 = vmatprep.mubr.msk.bf16.mxu1 %vm1134_vm1, %v4199_v2  ;;  %v3094_v6 = vshll.u32 %v4201_v1, 16 }
 0x11f   : > { %4122 = vmatprep.subr.msk.bf16.mxu1 %vm1225_vm0, %v4204_v43 }
 0x120   : > { %v3096_v26 = vrot.slane %v3094_v6, 1 }
 0x122   : > { %v3097_v42 = vsel %vm2885_vm5, %v3092_v52, %v3096_v26 }
 0x129   : > { %3911 = vmatmul.mubr.msk.bf16.vlgmr.msra.gmra.mrb[60].mxu1 %vm1134_vm1, %v4200_v15 }
 0x12a   : > { %3915 = vmatpush3.bf16.msra.mxu1 %v5142_v28  ;;  %3916 = vmatprep.mubr.msk.bf16.mxu1 %vm1134_vm1, %v3089_v55 }
 0x135   : > { %3917 = vmatmul.mubr.msk.bf16.vlgmr.msra.gmra.mrb[60].mxu1 %vm1134_vm1, %v3097_v42 }
 0x17a   : > { %v3838_v7 = vpop.f32.mrb[0].mxu0 }
 0x17b   : > { %v3922_v63 = vadd.f32 %v3838_v7, %v4916_v38  ;;  %v2463_v39 = vpop.f32.mrb[1].mxu0 }
 0x17c   : > { %v3722_v29 = vpop.f32.mrb[8].mxu1  ;;  %v3923_v41 = vadd.f32 %v2463_v39, %v4922_v23  ;;  %v3839_v37 = vpop.f32.mrb[2].mxu0 }
 0x17d   : > { %v1811_v3 = vpop.f32.mrb[9].mxu1  ;;  %v2764_v32 = vmax.f32 %v3922_v63, 0.0  ;;  %v3924_v46 = vadd.f32 %v3839_v37, %v4924_v35  ;;  %v2466_v13 = vpop.f32.mrb[3].mxu0 }
 0x17e   : > { %v3723_v18 = vpop.f32.mrb[10].mxu1  ;;  %v2762_v30 = vmax.f32 %v3923_v41, 0.0  ;;  %v3925_v34 = vadd.f32 %v2466_v13, %v4930_v12 }
 0x17f   : > { %v1814_v56 = vpop.f32.mrb[11].mxu1  ;;  %2824 = vst [vmem:[%s4988_s8 + $0x10] sm:$0xff] %v2764_v32  ;;  %v2765_v60 = vmax.f32 %v3924_v46, 0.0 }
 0x180   : > { %2822 = vst [vmem:[%s4988_s8] sm:$0xff] %v2762_v30  ;;  %v2763_v14 = vmax.f32 %v3925_v34, 0.0 }
 0x181   : > { %2825 = vst [vmem:[%s4988_s8 + $0x18] sm:$0xff] %v2765_v60 }
 0x182   : > { %2823 = vst [vmem:[%s4988_s8 + $0x8] sm:$0xff] %v2763_v14  ;;  %v3842_v21 = vpop.f32.mrb[4].mxu0 }
 0x183   : > { %v3926_v33 = vadd.f32 %v3842_v21, %v4936_v22  ;;  %v2479_v47 = vpop.f32.mrb[5].mxu0 }
 0x184   : > { %v3726_v61 = vpop.f32.mrb[12].mxu1  ;;  %v3927_v5 = vadd.f32 %v2479_v47, %v4942_v17  ;;  %v3843_v31 = vpop.f32.mrb[6].mxu0 }
 0x185   : > { %v1827_v38 = vpop.f32.mrb[13].mxu1  ;;  %v2768_v49 = vmax.f32 %v3926_v33, 0.0  ;;  %v3928_v59 = vadd.f32 %v3843_v31, %v4944_v10  ;;  %v2482_v23 = vpop.f32.mrb[7].mxu0 }
 0x186   : > { %v3727_v35 = vpop.f32.mrb[14].mxu1  ;;  %v2766_v51 = vmax.f32 %v3927_v5, 0.0  ;;  %v3929_v0 = vadd.f32 %v2482_v23, %v4947_v25 }
 0x187   : > { %v1830_v12 = vpop.f32.mrb[15].mxu1  ;;  %2828 = vst [vmem:[%s4988_s8 + $0x30] sm:$0xff] %v2768_v49  ;;  %v2769_v36 = vmax.f32 %v3928_v59, 0.0 }
 0x188   : > { %2826 = vst [vmem:[%s4988_s8 + $0x20] sm:$0xff] %v2766_v51  ;;  %v2767_v50 = vmax.f32 %v3929_v0, 0.0 }
 0x189   : > { %2829 = vst [vmem:[%s4988_s8 + $0x38] sm:$0xff] %v2769_v36 }
 0x18a   : > { %2827 = vst [vmem:[%s4988_s8 + $0x28] sm:$0xff] %v2767_v50  ;;  %v3846_v8 = vpop.f32.mrb[8].mxu0 }
 0x18b   : > { %v3930_v44 = vadd.f32 %v3846_v8, %v3722_v29  ;;  %v2495_v48 = vpop.f32.mrb[9].mxu0 }
 0x18c   : > { %v3730_v62 = vpop.f32.mrb[16].mxu1  ;;  %v3931_v22 = vadd.f32 %v2495_v48, %v1811_v3  ;;  %v3847_v57 = vpop.f32.mrb[10].mxu0 }
 0x18d   : > { %v1843_v17 = vpop.f32.mrb[17].mxu1  ;;  %v2772_v10 = vmax.f32 %v3930_v44, 0.0  ;;  %v3932_v53 = vadd.f32 %v3847_v57, %v3723_v18  ;;  %v2498_v24 = vpop.f32.mrb[11].mxu0 }
 0x18e   : > { %v3731_v25 = vpop.f32.mrb[18].mxu1  ;;  %v2770_v9 = vmax.f32 %v3931_v22, 0.0  ;;  %v3933_v20 = vadd.f32 %v2498_v24, %v1814_v56 }
 0x18f   : > { %v1846_v54 = vpop.f32.mrb[19].mxu1  ;;  %2832 = vst [vmem:[%s4988_s8 + $0x50] sm:$0xff] %v2772_v10  ;;  %v2773_v2 = vmax.f32 %v3932_v53, 0.0 }
 0x190   : > { %2830 = vst [vmem:[%s4988_s8 + $0x40] sm:$0xff] %v2770_v9  ;;  %v2771_v27 = vmax.f32 %v3933_v20, 0.0 }
 0x191   : > { %2833 = vst [vmem:[%s4988_s8 + $0x58] sm:$0xff] %v2773_v2 }
 0x192   : > { %2831 = vst [vmem:[%s4988_s8 + $0x48] sm:$0xff] %v2771_v27  ;;  %v3850_v15 = vpop.f32.mrb[12].mxu0 }
 0x193   : > { %v3934_v45 = vadd.f32 %v3850_v15, %v3726_v61  ;;  %v2511_v43 = vpop.f32.mrb[13].mxu0 }
 0x194   : > { %v3734_v19 = vpop.f32.mrb[20].mxu1  ;;  %v3935_v11 = vadd.f32 %v2511_v43, %v1827_v38  ;;  %v3851_v16 = vpop.f32.mrb[14].mxu0 }
 0x195   : > { %v1859_v58 = vpop.f32.mrb[21].mxu1  ;;  %v2776_v4 = vmax.f32 %v3934_v45, 0.0  ;;  %v3936_v1 = vadd.f32 %v3851_v16, %v3727_v35  ;;  %v2514_v55 = vpop.f32.mrb[15].mxu0 }
 0x196   : > { %v3735_v28 = vpop.f32.mrb[22].mxu1  ;;  %v2774_v40 = vmax.f32 %v3935_v11, 0.0  ;;  %v3937_v6 = vadd.f32 %v2514_v55, %v1830_v12 }
 0x197   : > { %v1862_v52 = vpop.f32.mrb[23].mxu1  ;;  %2836 = vst [vmem:[%s4988_s8 + $0x70] sm:$0xff] %v2776_v4  ;;  %v2777_v26 = vmax.f32 %v3936_v1, 0.0 }
 0x198   : > { %2834 = vst [vmem:[%s4988_s8 + $0x60] sm:$0xff] %v2774_v40  ;;  %v2775_v42 = vmax.f32 %v3937_v6, 0.0 }
 0x199   : > { %2837 = vst [vmem:[%s4988_s8 + $0x78] sm:$0xff] %v2777_v26 }
 0x19a   : > { %2835 = vst [vmem:[%s4988_s8 + $0x68] sm:$0xff] %v2775_v42  ;;  %v3854_v7 = vpop.f32.mrb[16].mxu0 }
 0x19b   : > { %v3938_v63 = vadd.f32 %v3854_v7, %v3730_v62  ;;  %v2527_v39 = vpop.f32.mrb[17].mxu0 }
 0x19c   : > { %v3738_v29 = vpop.f32.mrb[24].mxu1  ;;  %v3939_v41 = vadd.f32 %v2527_v39, %v1843_v17  ;;  %v3855_v37 = vpop.f32.mrb[18].mxu0 }
 0x19d   : > { %v1875_v3 = vpop.f32.mrb[25].mxu1  ;;  %v2780_v32 = vmax.f32 %v3938_v63, 0.0  ;;  %v3940_v46 = vadd.f32 %v3855_v37, %v3731_v25  ;;  %v2530_v13 = vpop.f32.mrb[19].mxu0 }
 0x19e   : > { %v3739_v18 = vpop.f32.mrb[26].mxu1  ;;  %v2778_v30 = vmax.f32 %v3939_v41, 0.0  ;;  %v3941_v34 = vadd.f32 %v2530_v13, %v1846_v54 }
 0x19f   : > { %v1878_v56 = vpop.f32.mrb[27].mxu1  ;;  %2840 = vst [vmem:[%s4988_s8 + $0x90] sm:$0xff] %v2780_v32  ;;  %v2781_v60 = vmax.f32 %v3940_v46, 0.0 }
 0x1a0   : > { %2838 = vst [vmem:[%s4988_s8 + $0x80] sm:$0xff] %v2778_v30  ;;  %v2779_v14 = vmax.f32 %v3941_v34, 0.0 }
 0x1a1   : > { %2841 = vst [vmem:[%s4988_s8 + $0x98] sm:$0xff] %v2781_v60 }
 0x1a2   : > { %2839 = vst [vmem:[%s4988_s8 + $0x88] sm:$0xff] %v2779_v14  ;;  %v3858_v21 = vpop.f32.mrb[20].mxu0 }
 0x1a3   : > { %v3942_v33 = vadd.f32 %v3858_v21, %v3734_v19  ;;  %v2543_v47 = vpop.f32.mrb[21].mxu0 }
 0x1a4   : > { %v3742_v61 = vpop.f32.mrb[28].mxu1  ;;  %v3943_v5 = vadd.f32 %v2543_v47, %v1859_v58  ;;  %v3859_v31 = vpop.f32.mrb[22].mxu0 }
 0x1a5   : > { %v1891_v38 = vpop.f32.mrb[29].mxu1  ;;  %v2784_v49 = vmax.f32 %v3942_v33, 0.0  ;;  %v3944_v59 = vadd.f32 %v3859_v31, %v3735_v28  ;;  %v2546_v23 = vpop.f32.mrb[23].mxu0 }
 0x1a6   : > { %v3743_v35 = vpop.f32.mrb[30].mxu1  ;;  %v2782_v51 = vmax.f32 %v3943_v5, 0.0  ;;  %v3945_v0 = vadd.f32 %v2546_v23, %v1862_v52 }
 0x1a7   : > { %v1894_v12 = vpop.f32.mrb[31].mxu1  ;;  %2844 = vst [vmem:[%s4988_s8 + $0xb0] sm:$0xff] %v2784_v49  ;;  %v2785_v36 = vmax.f32 %v3944_v59, 0.0 }
 0x1a8   : > { %2842 = vst [vmem:[%s4988_s8 + $0xa0] sm:$0xff] %v2782_v51  ;;  %v2783_v50 = vmax.f32 %v3945_v0, 0.0 }
 0x1a9   : > { %2845 = vst [vmem:[%s4988_s8 + $0xb8] sm:$0xff] %v2785_v36 }
 0x1aa   : > { %2843 = vst [vmem:[%s4988_s8 + $0xa8] sm:$0xff] %v2783_v50  ;;  %v3862_v8 = vpop.f32.mrb[24].mxu0 }
 0x1ab   : > { %v3946_v44 = vadd.f32 %v3862_v8, %v3738_v29  ;;  %v2559_v48 = vpop.f32.mrb[25].mxu0 }
 0x1ac   : > { %v3746_v62 = vpop.f32.mrb[32].mxu1  ;;  %v3947_v22 = vadd.f32 %v2559_v48, %v1875_v3  ;;  %v3863_v57 = vpop.f32.mrb[26].mxu0 }
 0x1ad   : > { %v1907_v17 = vpop.f32.mrb[33].mxu1  ;;  %v2788_v10 = vmax.f32 %v3946_v44, 0.0  ;;  %v3948_v53 = vadd.f32 %v3863_v57, %v3739_v18  ;;  %v2562_v24 = vpop.f32.mrb[27].mxu0 }
 0x1ae   : > { %v3747_v25 = vpop.f32.mrb[34].mxu1  ;;  %v2786_v9 = vmax.f32 %v3947_v22, 0.0  ;;  %v3949_v20 = vadd.f32 %v2562_v24, %v1878_v56 }
 0x1af   : > { %v1910_v54 = vpop.f32.mrb[35].mxu1  ;;  %2848 = vst [vmem:[%s4988_s8 + $0xd0] sm:$0xff] %v2788_v10  ;;  %v2789_v2 = vmax.f32 %v3948_v53, 0.0 }
 0x1b0   : > { %2846 = vst [vmem:[%s4988_s8 + $0xc0] sm:$0xff] %v2786_v9  ;;  %v2787_v27 = vmax.f32 %v3949_v20, 0.0 }
 0x1b1   : > { %2849 = vst [vmem:[%s4988_s8 + $0xd8] sm:$0xff] %v2789_v2 }
 0x1b2   : > { %2847 = vst [vmem:[%s4988_s8 + $0xc8] sm:$0xff] %v2787_v27  ;;  %v3866_v15 = vpop.f32.mrb[28].mxu0 }
 0x1b3   : > { %v3950_v45 = vadd.f32 %v3866_v15, %v3742_v61  ;;  %v2575_v43 = vpop.f32.mrb[29].mxu0 }
 0x1b4   : > { %v3750_v19 = vpop.f32.mrb[36].mxu1  ;;  %v3951_v11 = vadd.f32 %v2575_v43, %v1891_v38  ;;  %v3867_v16 = vpop.f32.mrb[30].mxu0 }
 0x1b5   : > { %v1923_v58 = vpop.f32.mrb[37].mxu1  ;;  %v2792_v4 = vmax.f32 %v3950_v45, 0.0  ;;  %v3952_v1 = vadd.f32 %v3867_v16, %v3743_v35  ;;  %v2578_v55 = vpop.f32.mrb[31].mxu0 }
 0x1b6   : > { %v3751_v28 = vpop.f32.mrb[38].mxu1  ;;  %v2790_v40 = vmax.f32 %v3951_v11, 0.0  ;;  %v3953_v6 = vadd.f32 %v2578_v55, %v1894_v12 }
 0x1b7   : > { %v1926_v52 = vpop.f32.mrb[39].mxu1  ;;  %2852 = vst [vmem:[%s4988_s8 + $0xf0] sm:$0xff] %v2792_v4  ;;  %v2793_v26 = vmax.f32 %v3952_v1, 0.0 }
 0x1b8   : > { %2850 = vst [vmem:[%s4988_s8 + $0xe0] sm:$0xff] %v2790_v40  ;;  %v2791_v42 = vmax.f32 %v3953_v6, 0.0 }
 0x1b9   : > { %2853 = vst [vmem:[%s4988_s8 + $0xf8] sm:$0xff] %v2793_v26 }
 0x1ba   : > { %2851 = vst [vmem:[%s4988_s8 + $0xe8] sm:$0xff] %v2791_v42  ;;  %v3870_v7 = vpop.f32.mrb[32].mxu0 }
 0x1bb   : > { %v3954_v63 = vadd.f32 %v3870_v7, %v3746_v62  ;;  %v2591_v39 = vpop.f32.mrb[33].mxu0 }
 0x1bc   : > { %v3754_v29 = vpop.f32.mrb[40].mxu1  ;;  %v3955_v41 = vadd.f32 %v2591_v39, %v1907_v17  ;;  %v3871_v37 = vpop.f32.mrb[34].mxu0 }
 0x1bd   : > { %v1939_v3 = vpop.f32.mrb[41].mxu1  ;;  %v2796_v32 = vmax.f32 %v3954_v63, 0.0  ;;  %v3956_v46 = vadd.f32 %v3871_v37, %v3747_v25  ;;  %v2594_v13 = vpop.f32.mrb[35].mxu0 }
 0x1be   : > { %v3755_v18 = vpop.f32.mrb[42].mxu1  ;;  %v2794_v30 = vmax.f32 %v3955_v41, 0.0  ;;  %v3957_v34 = vadd.f32 %v2594_v13, %v1910_v54 }
 0x1bf   : > { %v1942_v56 = vpop.f32.mrb[43].mxu1  ;;  %2856 = vst [vmem:[%s4988_s8 + $0x110] sm:$0xff] %v2796_v32  ;;  %v2797_v60 = vmax.f32 %v3956_v46, 0.0 }
 0x1c0   : > { %2854 = vst [vmem:[%s4988_s8 + $0x100] sm:$0xff] %v2794_v30  ;;  %v2795_v14 = vmax.f32 %v3957_v34, 0.0 }
 0x1c1   : > { %2857 = vst [vmem:[%s4988_s8 + $0x118] sm:$0xff] %v2797_v60 }
 0x1c2   : > { %2855 = vst [vmem:[%s4988_s8 + $0x108] sm:$0xff] %v2795_v14  ;;  %v3874_v21 = vpop.f32.mrb[36].mxu0 }
 0x1c3   : > { %v3958_v33 = vadd.f32 %v3874_v21, %v3750_v19  ;;  %v2607_v47 = vpop.f32.mrb[37].mxu0 }
 0x1c4   : > { %v3758_v61 = vpop.f32.mrb[44].mxu1  ;;  %v3959_v5 = vadd.f32 %v2607_v47, %v1923_v58  ;;  %v3875_v31 = vpop.f32.mrb[38].mxu0 }
 0x1c5   : > { %v1955_v38 = vpop.f32.mrb[45].mxu1  ;;  %v2800_v49 = vmax.f32 %v3958_v33, 0.0  ;;  %v3960_v59 = vadd.f32 %v3875_v31, %v3751_v28  ;;  %v2610_v23 = vpop.f32.mrb[39].mxu0 }
 0x1c6   : > { %v3759_v35 = vpop.f32.mrb[46].mxu1  ;;  %v2798_v51 = vmax.f32 %v3959_v5, 0.0  ;;  %v3961_v0 = vadd.f32 %v2610_v23, %v1926_v52 }
 0x1c7   : > { %v1958_v12 = vpop.f32.mrb[47].mxu1  ;;  %2860 = vst [vmem:[%s4988_s8 + $0x130] sm:$0xff] %v2800_v49  ;;  %v2801_v36 = vmax.f32 %v3960_v59, 0.0 }
 0x1c8   : > { %2858 = vst [vmem:[%s4988_s8 + $0x120] sm:$0xff] %v2798_v51  ;;  %v2799_v50 = vmax.f32 %v3961_v0, 0.0 }
 0x1c9   : > { %2861 = vst [vmem:[%s4988_s8 + $0x138] sm:$0xff] %v2801_v36 }
 0x1ca   : > { %2859 = vst [vmem:[%s4988_s8 + $0x128] sm:$0xff] %v2799_v50  ;;  %v3878_v8 = vpop.f32.mrb[40].mxu0 }
 0x1cb   : > { %v3962_v44 = vadd.f32 %v3878_v8, %v3754_v29  ;;  %v2623_v48 = vpop.f32.mrb[41].mxu0 }
 0x1cc   : > { %v3762_v62 = vpop.f32.mrb[48].mxu1  ;;  %v3963_v22 = vadd.f32 %v2623_v48, %v1939_v3  ;;  %v3879_v57 = vpop.f32.mrb[42].mxu0 }
 0x1cd   : > { %v1971_v17 = vpop.f32.mrb[49].mxu1  ;;  %v2804_v10 = vmax.f32 %v3962_v44, 0.0  ;;  %v3964_v53 = vadd.f32 %v3879_v57, %v3755_v18  ;;  %v2626_v24 = vpop.f32.mrb[43].mxu0 }
 0x1ce   : > { %v3763_v25 = vpop.f32.mrb[50].mxu1  ;;  %v2802_v9 = vmax.f32 %v3963_v22, 0.0  ;;  %v3965_v20 = vadd.f32 %v2626_v24, %v1942_v56 }
 0x1cf   : > { %v1974_v54 = vpop.f32.mrb[51].mxu1  ;;  %2864 = vst [vmem:[%s4988_s8 + $0x150] sm:$0xff] %v2804_v10  ;;  %v2805_v2 = vmax.f32 %v3964_v53, 0.0 }
 0x1d0   : > { %2862 = vst [vmem:[%s4988_s8 + $0x140] sm:$0xff] %v2802_v9  ;;  %v2803_v27 = vmax.f32 %v3965_v20, 0.0 }
 0x1d1   : > { %2865 = vst [vmem:[%s4988_s8 + $0x158] sm:$0xff] %v2805_v2 }
 0x1d2   : > { %2863 = vst [vmem:[%s4988_s8 + $0x148] sm:$0xff] %v2803_v27  ;;  %v3882_v15 = vpop.f32.mrb[44].mxu0 }
 0x1d3   : > { %v3966_v45 = vadd.f32 %v3882_v15, %v3758_v61  ;;  %v2639_v43 = vpop.f32.mrb[45].mxu0 }
 0x1d4   : > { %v3766_v19 = vpop.f32.mrb[52].mxu1  ;;  %v3967_v11 = vadd.f32 %v2639_v43, %v1955_v38  ;;  %v3883_v16 = vpop.f32.mrb[46].mxu0 }
 0x1d5   : > { %v1987_v58 = vpop.f32.mrb[53].mxu1  ;;  %v2808_v4 = vmax.f32 %v3966_v45, 0.0  ;;  %v3968_v1 = vadd.f32 %v3883_v16, %v3759_v35  ;;  %v2642_v55 = vpop.f32.mrb[47].mxu0 }
 0x1d6   : > { %v3767_v28 = vpop.f32.mrb[54].mxu1  ;;  %v2806_v40 = vmax.f32 %v3967_v11, 0.0  ;;  %v3969_v6 = vadd.f32 %v2642_v55, %v1958_v12 }
 0x1d7   : > { %v1990_v52 = vpop.f32.mrb[55].mxu1  ;;  %2868 = vst [vmem:[%s4988_s8 + $0x170] sm:$0xff] %v2808_v4  ;;  %v2809_v26 = vmax.f32 %v3968_v1, 0.0 }
 0x1d8   : > { %2866 = vst [vmem:[%s4988_s8 + $0x160] sm:$0xff] %v2806_v40  ;;  %v2807_v42 = vmax.f32 %v3969_v6, 0.0 }
 0x1d9   : > { %2869 = vst [vmem:[%s4988_s8 + $0x178] sm:$0xff] %v2809_v26 }
 0x1da   : > { %2867 = vst [vmem:[%s4988_s8 + $0x168] sm:$0xff] %v2807_v42  ;;  %v3886_v7 = vpop.f32.mrb[48].mxu0 }
 0x1db   : > { %v3970_v63 = vadd.f32 %v3886_v7, %v3762_v62  ;;  %v2655_v39 = vpop.f32.mrb[49].mxu0 }
 0x1dc   : > { %v3770_v29 = vpop.f32.mrb[56].mxu1  ;;  %v3971_v41 = vadd.f32 %v2655_v39, %v1971_v17  ;;  %v3887_v37 = vpop.f32.mrb[50].mxu0 }
 0x1dd   : > { %v2003_v3 = vpop.f32.mrb[57].mxu1  ;;  %v2812_v32 = vmax.f32 %v3970_v63, 0.0  ;;  %v3972_v46 = vadd.f32 %v3887_v37, %v3763_v25  ;;  %v2658_v13 = vpop.f32.mrb[51].mxu0 }
 0x1de   : > { %v3771_v18 = vpop.f32.mrb[58].mxu1  ;;  %v2810_v30 = vmax.f32 %v3971_v41, 0.0  ;;  %v3973_v34 = vadd.f32 %v2658_v13, %v1974_v54 }
 0x1df   : > { %v2006_v56 = vpop.f32.mrb[59].mxu1  ;;  %2872 = vst [vmem:[%s4988_s8 + $0x190] sm:$0xff] %v2812_v32  ;;  %v2813_v60 = vmax.f32 %v3972_v46, 0.0 }
 0x1e0   : > { %2870 = vst [vmem:[%s4988_s8 + $0x180] sm:$0xff] %v2810_v30  ;;  %v2811_v14 = vmax.f32 %v3973_v34, 0.0 }
 0x1e1   : > { %2873 = vst [vmem:[%s4988_s8 + $0x198] sm:$0xff] %v2813_v60 }
 0x1e2   : > { %2871 = vst [vmem:[%s4988_s8 + $0x188] sm:$0xff] %v2811_v14  ;;  %v3890_v21 = vpop.f32.mrb[52].mxu0 }
 0x1e3   : > { %v3974_v33 = vadd.f32 %v3890_v21, %v3766_v19  ;;  %v2671_v47 = vpop.f32.mrb[53].mxu0 }
 0x1e4   : > { %v3975_v61 = vadd.f32 %v2671_v47, %v1987_v58  ;;  %v3891_v5 = vpop.f32.mrb[54].mxu0 }
 0x1e5   : > { %v2816_v31 = vmax.f32 %v3974_v33, 0.0  ;;  %v3976_v38 = vadd.f32 %v3891_v5, %v3767_v28  ;;  %v2674_v49 = vpop.f32.mrb[55].mxu0 }
 0x1e6   : > { %v2814_v59 = vmax.f32 %v3975_v61, 0.0  ;;  %v3977_v23 = vadd.f32 %v2674_v49, %v1990_v52 }
 0x1e7   : > { %2876 = vst [vmem:[%s4988_s8 + $0x1b0] sm:$0xff] %v2816_v31  ;;  %v2817_v35 = vmax.f32 %v3976_v38, 0.0 }
 0x1e8   : > { %2874 = vst [vmem:[%s4988_s8 + $0x1a0] sm:$0xff] %v2814_v59  ;;  %v2815_v51 = vmax.f32 %v3977_v23, 0.0 }
 0x1e9   : > { %2877 = vst [vmem:[%s4988_s8 + $0x1b8] sm:$0xff] %v2817_v35 }
 0x1ea   : > { %2875 = vst [vmem:[%s4988_s8 + $0x1a8] sm:$0xff] %v2815_v51  ;;  %v3894_v0 = vpop.f32.mrb[56].mxu0 }
 0x1eb   : > { %v3978_v12 = vadd.f32 %v3894_v0, %v3770_v29  ;;  %v2687_v36 = vpop.f32.mrb[57].mxu0 }
 0x1ec   : > { %v3979_v50 = vadd.f32 %v2687_v36, %v2003_v3  ;;  %v3895_v8 = vpop.f32.mrb[58].mxu0 }
 0x1ed   : > { %v2820_v44 = vmax.f32 %v3978_v12, 0.0  ;;  %v3980_v48 = vadd.f32 %v3895_v8, %v3771_v18  ;;  %v2690_v62 = vpop.f32.mrb[59].mxu0 }
 0x1ee   : > { %v2818_v22 = vmax.f32 %v3979_v50, 0.0  ;;  %v3981_v57 = vadd.f32 %v2690_v62, %v2006_v56 }
 0x1ef   : > { %2880 = vst [vmem:[%s4988_s8 + $0x1d0] sm:$0xff] %v2820_v44  ;;  %v2821_v17 = vmax.f32 %v3980_v48, 0.0 }
 0x1f0   : > { %2878 = vst [vmem:[%s4988_s8 + $0x1c0] sm:$0xff] %v2818_v22  ;;  %v2819_v10 = vmax.f32 %v3981_v57, 0.0 }
 0x1f1   : > { %2881 = vst [vmem:[%s4988_s8 + $0x1d8] sm:$0xff] %v2821_v17 }
 0x1f2   : > { %2879 = vst [vmem:[%s4988_s8 + $0x1c8] sm:$0xff] %v2819_v10 }
 0x208   : > { %v3918_v53 = vpop.f32.mrb[60].mxu1 }
 0x209   : > { %v3159_v24 = vmax.f32 %v3918_v53, 0.0  ;;  %v3138_v25 = vpop.f32.mrb[61].mxu1 }
 0x20a   : > { %v3157_v9 = vmax.f32 %v3138_v25, 0.0  ;;  %v3919_v20 = vpop.f32.mrb[62].mxu1 }
 0x20b   : > { %3502 = vst [vmem:[%s4988_s8 + $0x1f0] sm:$0xff] %v3159_v24  ;;  %v3160_v54 = vmax.f32 %v3919_v20, 0.0  ;;  %v3141_v2 = vpop.f32.mrb[63].mxu1 }
 0x20c   : > { %3500 = vst [vmem:[%s4988_s8 + $0x1e0] sm:$0xff] %v3157_v9  ;;  %v3158_v27 = vmax.f32 %v3141_v2, 0.0 }
 0x20d   : > { %3503 = vst [vmem:[%s4988_s8 + $0x1f8] sm:$0xff] %v3160_v54 }
 0x20e   : > { %3501 = vst [vmem:[%s4988_s8 + $0x1e8] sm:$0xff] %v3158_v27 }
 0x20f PF: > { %s13_s16 = sadd.s32 1, %s4243_s16   ;;  %s5143_s12 = smov %s4235_s14 }
 0x210   : > { %p10_p9 = scmp.ge.s32.totalorder %s13_s16, 6   ;;  %s5144_s13 = smov %s4239_s15 }
 0x211   : > { %s5145_s14 = smov %s5148_s17  ;;  %s5146_s15 = smov %s5152_s18 }
 0x212   :  { %12 = sbr.rel (!%p10_p9) target bundleno = 3 (0x3), region = 69 }

</bundles_post_ra>
